<compile_context>
chip_gen: v7x
topology: tpu7x:2x2x1
jax: 0.10.0
libtpu: 0.0.40
codegen_flags: <defaults>
</compile_context>

<pallas_src>
import functools

import jax
import jax.numpy as jnp
from jax import lax
from jax.experimental import pallas as pl
from jax.experimental.pallas import tpu as pltpu


# -----------------------------------------------------------------------------
# Helpers
# -----------------------------------------------------------------------------
def _coerce_time_chunk(T, requested):
    """Largest chunk <= requested that divides T."""
    c = max(1, min(T, int(requested)))
    while T % c:
        c -= 1
    return c


def _default_time_chunk(T, B2, H, itemsize):
    # Size Tc so the double-buffered streamed blocks (gx fwd+bwd: 3H wide,
    # y fwd+bwd: H wide) stay under ~20 MiB: fits v7x's 64 MiB physical VMEM
    # and the 16/32 MiB scoped defaults with headroom.
    budget = 20 << 20
    per_step = 2 * (2 * B2 * 3 * H + 2 * B2 * H) * itemsize  # x2 double-buffer
    return max(1, min(T, budget // max(per_step, 1)))


# -----------------------------------------------------------------------------
# Layer-0 kernel: both directions, time-chunked.
# grid=(T//Tc,), "arbitrary".  Hidden states live in VMEM scratch across chunks.
# Refs:
#   gxf_ref : (Tc, 2B, 3H)  X @ W_ih^T + b_ih + [b_hh_r, b_hh_z, 0]  (fwd)
#   gxb_ref : (Tc, 2B, 3H)  same for the backward dir, TIME-FLIPPED
#   whh_ref : (2, H, 3H)    W_hh^T per direction
#   bhn_ref : (2, 1, H)     n-gate b_hh per direction (must stay inside r*(.))
#   yf_ref  : (Tc, 2B, H)   forward outputs (original time order)
#   yb_ref  : (Tc, 2B, H)   backward outputs (original time order; chunk index
#                           reversed by the out_spec, position reversed here)
# PyTorch GRU gate order: [r, z, n]; n uses r * (W_hn h + b_hn).
# -----------------------------------------------------------------------------
def bigru_layer0_kernel(gxf_ref, gxb_ref, whh_ref, bhn_ref,
                        yf_ref, yb_ref, hf_sc, hb_sc):
    t = pl.program_id(0)
    Tc, B2, _ = gxf_ref.shape
    H = whh_ref.shape[1]

    @pl.when(t == 0)
    def _init():
        hf_sc[...] = jnp.zeros_like(hf_sc)
        hb_sc[...] = jnp.zeros_like(hb_sc)

    whh_f = whh_ref[0]            # (H, 3H)
    whh_b = whh_ref[1]
    bhn_f = bhn_ref[0]            # (1, H)
    bhn_b = bhn_ref[1]

    def gru_step(gx, h, whh, bhn):
        # bf16 operands on the MXU, f32 accumulation; h carried in f32.
        gh = jnp.dot(h.astype(whh.dtype), whh,
                     preferred_element_type=jnp.float32)          # (2B, 3H)
        gx = gx.astype(jnp.float32)
        r = jax.nn.sigmoid(gx[:, 0:H] + gh[:, 0:H])
        z = jax.nn.sigmoid(gx[:, H:2 * H] + gh[:, H:2 * H])
        n = jnp.tanh(gx[:, 2 * H:] + r * (gh[:, 2 * H:] + bhn))
        return (1.0 - z) * n + z * h

    def step(s, carry):
        hf, hb = carry
        hf = gru_step(gxf_ref[s], hf, whh_f, bhn_f)
        hb = gru_step(gxb_ref[s], hb, whh_b, bhn_b)
        yf_ref[pl.ds(s, 1), :, :] = hf[None, :, :].astype(yf_ref.dtype)
        # backward: processing step s within this chunk is original in-chunk
        # position Tc-1-s (the chunk itself is re-targeted by the out_spec).
        yb_ref[pl.ds(Tc - 1 - s, 1), :, :] = hb[None, :, :].astype(yb_ref.dtype)
        return hf, hb

    hf, hb = lax.fori_loop(0, Tc, step, (hf_sc[...], hb_sc[...]),
                           unroll=min(Tc, 8))
    hf_sc[...] = hf
    hb_sc[...] = hb


def bigru_layer0(gxf, gxb, whh, bhn, *, time_chunk):
    """gxf/gxb: (T, 2B, 3H), whh: (2, H, 3H), bhn: (2, 1, H)
    -> (yf, yb), each (T, 2B, H) in original time order."""
    T, B2, G = gxf.shape
    H = whh.shape[1]
    Tc = time_chunk
    nT = T // Tc

    itm = jnp.dtype(gxf.dtype).itemsize
    itm_w = jnp.dtype(whh.dtype).itemsize
    stream_bytes = 2 * Tc * B2 * G * itm + 2 * Tc * B2 * H * itm
    resident_bytes = whh.size * itm_w + bhn.size * 4 + 2 * B2 * H * 4
    vmem_limit = int(2 * stream_bytes + 2 * resident_bytes + (8 << 20))

    cost = pl.CostEstimate(
        flops=int(2 * 2 * T * B2 * H * 3 * H),
        transcendentals=int(2 * T * B2 * 3 * H),
        bytes_accessed=int(2 * T * B2 * G * itm + 2 * T * B2 * H * itm
                           + whh.size * itm_w))

    return pl.pallas_call(
        bigru_layer0_kernel,
        out_shape=(jax.ShapeDtypeStruct((T, B2, H), gxf.dtype),
                   jax.ShapeDtypeStruct((T, B2, H), gxf.dtype)),
        grid=(nT,),
        in_specs=[
            pl.BlockSpec((Tc, B2, G), lambda t: (t, 0, 0)),
            pl.BlockSpec((Tc, B2, G), lambda t: (t, 0, 0)),
            pl.BlockSpec((2, H, G), lambda t: (0, 0, 0)),
            pl.BlockSpec((2, 1, H), lambda t: (0, 0, 0)),
        ],
        out_specs=(
            pl.BlockSpec((Tc, B2, H), lambda t: (t, 0, 0)),
            # backward chunk t lands at original-time chunk nT-1-t
            pl.BlockSpec((Tc, B2, H), lambda t: (nT - 1 - t, 0, 0)),
        ),
        scratch_shapes=[pltpu.VMEM((B2, H), jnp.float32),
                        pltpu.VMEM((B2, H), jnp.float32)],
        compiler_params=pltpu.CompilerParams(
            dimension_semantics=("arbitrary",),
            vmem_limit_bytes=vmem_limit),
        cost_estimate=cost,
    )(gxf, gxb, whh, bhn)


# -----------------------------------------------------------------------------
# Layer-1 + head kernel, time-chunked:
#   * forward direction: full recurrence over time chunks, keep only the final
#     hidden state (scratch-carried)
#   * on the LAST chunk: backward single step from h0 = 0 (its output at time
#     T-1), then enc1*enc2 -> Linear -> softmax (concat replaced by a split
#     matmul over fwd/bwd halves of the FC weight).
# -----------------------------------------------------------------------------
def layer1_head_kernel(gxf_ref, gxb_ref, whh_ref, bhnf_ref, bhnb_ref,
                       fcw_ref, fcb_ref, logits_ref, probs_ref, h_sc):
    t = pl.program_id(0)
    n_chunks = pl.num_programs(0)
    Tc, _, _ = gxf_ref.shape
    H = whh_ref.shape[0]
    B = logits_ref.shape[0]

    @pl.when(t == 0)
    def _init():
        h_sc[...] = jnp.zeros_like(h_sc)

    whh = whh_ref[...]
    bhn = bhnf_ref[...]

    def step(s, h):
        gx = gxf_ref[s].astype(jnp.float32)
        gh = jnp.dot(h.astype(whh.dtype), whh,
                     preferred_element_type=jnp.float32)
        r = jax.nn.sigmoid(gx[:, 0:H] + gh[:, 0:H])
        z = jax.nn.sigmoid(gx[:, H:2 * H] + gh[:, H:2 * H])
        n = jnp.tanh(gx[:, 2 * H:] + r * (gh[:, 2 * H:] + bhn))
        return (1.0 - z) * n + z * h

    hf = lax.fori_loop(0, Tc, step, h_sc[...], unroll=min(Tc, 8))
    h_sc[...] = hf

    @pl.when(t == n_chunks - 1)
    def _head():
        # Backward direction: one step from h0 = 0.  gxb already contains
        # b_ih + [b_hh_r, b_hh_z, 0]; only the n-gate's b_hn stays under r*().
        gxb = gxb_ref[...].astype(jnp.float32)
        bnb = bhnb_ref[...]
        rb = jax.nn.sigmoid(gxb[:, 0:H])
        zb = jax.nn.sigmoid(gxb[:, H:2 * H])
        nb = jnp.tanh(gxb[:, 2 * H:] + rb * bnb)
        hb = (1.0 - zb) * nb                                      # (2B, H)

        pf = hf[:B] * hf[B:]                                      # (B, H)
        pb = hb[:B] * hb[B:]
        fcw = fcw_ref[...]
        x = (jnp.dot(pf.astype(fcw.dtype), fcw[0:H, :],
                     preferred_element_type=jnp.float32)
             + jnp.dot(pb.astype(fcw.dtype), fcw[H:, :],
                       preferred_element_type=jnp.float32)
             + fcb_ref[...])
        logits_ref[...] = x
        m = jnp.max(x, axis=-1, keepdims=True)
        e = jnp.exp(x - m)
        probs_ref[...] = e / jnp.sum(e, axis=-1, keepdims=True)


def layer1_and_head(gxf1, gxb1_last, whh1f_t, bhn1f, bhn1b, fc_w_t, fc_b,
                    *, batch, time_chunk):
    T, B2, G = gxf1.shape
    H = whh1f_t.shape[0]
    L = fc_w_t.shape[1]
    Tc = time_chunk
    nT = T // Tc

    itm = jnp.dtype(gxf1.dtype).itemsize
    stream_bytes = Tc * B2 * G * itm
    resident_bytes = (gxb1_last.size * jnp.dtype(gxb1_last.dtype).itemsize
                      + whh1f_t.size * jnp.dtype(whh1f_t.dtype).itemsize
                      + fc_w_t.size * jnp.dtype(fc_w_t.dtype).itemsize
                      + 2 * H * 4 + B2 * H * 4 + 2 * batch * L * 4)
    vmem_limit = int(2 * stream_bytes + 2 * resident_bytes + (8 << 20))

    cost = pl.CostEstimate(
        flops=int(2 * T * B2 * H * 3 * H + 2 * 2 * batch * H * L),
        transcendentals=int(T * B2 * 3 * H + B2 * 3 * H + batch * L),
        bytes_accessed=int(T * B2 * G * itm + resident_bytes))

    return pl.pallas_call(
        layer1_head_kernel,
        out_shape=(jax.ShapeDtypeStruct((batch, L), jnp.float32),
                   jax.ShapeDtypeStruct((batch, L), jnp.float32)),
        grid=(nT,),
        in_specs=[
            pl.BlockSpec((Tc, B2, G), lambda t: (t, 0, 0)),
            pl.BlockSpec((B2, G), lambda t: (0, 0)),
            pl.BlockSpec((H, G), lambda t: (0, 0)),
            pl.BlockSpec((1, H), lambda t: (0, 0)),
            pl.BlockSpec((1, H), lambda t: (0, 0)),
            pl.BlockSpec((2 * H, L), lambda t: (0, 0)),
            pl.BlockSpec((1, L), lambda t: (0, 0)),
        ],
        out_specs=(
            pl.BlockSpec((batch, L), lambda t: (0, 0)),
            pl.BlockSpec((batch, L), lambda t: (0, 0)),
        ),
        scratch_shapes=[pltpu.VMEM((B2, H), jnp.float32)],
        compiler_params=pltpu.CompilerParams(
            dimension_semantics=("arbitrary",),
            vmem_limit_bytes=vmem_limit),
        cost_estimate=cost,
    )(gxf1, gxb1_last, whh1f_t, bhn1f, bhn1b, fc_w_t, fc_b)


# -----------------------------------------------------------------------------
# Full BiGRU forward.
# -----------------------------------------------------------------------------
def bigru_forward(sent1, sent2, params, *, time_chunk=None,
                  compute_dtype=jnp.float32):
    emb = params["emb"]
    wih0f_t, whh0f_t, bih0f, bhh0f = params["l0f"]
    wih0b_t, whh0b_t, bih0b, bhh0b = params["l0b"]
    wih1f_t, whh1f_t, bih1f, bhh1f = params["l1f"]
    wih1b_t, whh1b_t, bih1b, bhh1b = params["l1b"]
    H = whh0f_t.shape[0]
    B, T = sent1.shape
    cdt = compute_dtype
    itm = jnp.dtype(cdt).itemsize

    if time_chunk is None:
        time_chunk = _default_time_chunk(T, 2 * B, H, itm)
    Tc = _coerce_time_chunk(T, time_chunk)

    # Embedding gather (glue) + inference dropout (identity); both sentences
    # share one 2B batch through the encoder.
    x = jnp.concatenate([emb[sent1], emb[sent2]], axis=0).astype(cdt)  # (2B,T,D)

    def fold_rz(b_ih, b_hh):
        # Fold the hidden bias of the r/z gates into the precomputed gx; the
        # n-gate's b_hh must stay inside the r*(...) term.
        return b_ih + jnp.concatenate(
            [b_hh[:2 * H], jnp.zeros((H,), b_hh.dtype)])

    # ---- layer 0: hoisted input projections (big MXU matmuls), time-major,
    #      backward direction time-flipped so the kernel always steps forward.
    gx0f = (jnp.einsum("btd,dk->tbk", x, wih0f_t.astype(cdt),
                       preferred_element_type=jnp.float32)
            + fold_rz(bih0f, bhh0f)).astype(cdt)
    gx0b = (jnp.einsum("btd,dk->tbk", x[:, ::-1, :], wih0b_t.astype(cdt),
                       preferred_element_type=jnp.float32)
            + fold_rz(bih0b, bhh0b)).astype(cdt)

    whh0 = jnp.stack([whh0f_t, whh0b_t]).astype(cdt)               # (2, H, 3H)
    bhn0 = jnp.stack([bhh0f[2 * H:], bhh0b[2 * H:]])[:, None, :]   # (2, 1, H)

    yf, yb = bigru_layer0(gx0f, gx0b, whh0, bhn0, time_chunk=Tc)   # (T,2B,H) x2

    # ---- layer 1: forward-dir input projection for all T (split matmul ==
    #      concat @ W); backward dir only needs its input at t = T-1.
    gxf1 = (jnp.einsum("tbh,hk->tbk", yf, wih1f_t[:H].astype(cdt),
                       preferred_element_type=jnp.float32)
            + jnp.einsum("tbh,hk->tbk", yb, wih1f_t[H:].astype(cdt),
                         preferred_element_type=jnp.float32)
            + fold_rz(bih1f, bhh1f)).astype(cdt)                   # (T, 2B, 3H)

    gxb1_last = (jnp.dot(yf[-1], wih1b_t[:H].astype(cdt),
                         preferred_element_type=jnp.float32)
                 + jnp.dot(yb[-1], wih1b_t[H:].astype(cdt),
                           preferred_element_type=jnp.float32)
                 + fold_rz(bih1b, bhh1b)).astype(cdt)              # (2B, 3H)

    bhn1f = bhh1f[2 * H:][None, :]                                 # (1, H)
    bhn1b = bhh1b[2 * H:][None, :]

    logits, probs = layer1_and_head(
        gxf1, gxb1_last, whh1f_t.astype(cdt), bhn1f, bhn1b,
        params["fc_w_t"].astype(cdt),
        params["fc_b"][None, :].astype(jnp.float32),
        batch=B, time_chunk=Tc)
    return logits, probs


# -----------------------------------------------------------------------------
# Pure-JAX reference (validation of the Pallas kernels).
# -----------------------------------------------------------------------------
def ref_gru_dir(x_tbd, w_ih_t, w_hh_t, b_ih, b_hh, reverse):
    T, B, _ = x_tbd.shape
    H = w_hh_t.shape[0]
    h = jnp.zeros((B, H), jnp.float32)
    outs = [None] * T
    order = range(T - 1, -1, -1) if reverse else range(T)
    for t in order:
        gx = x_tbd[t] @ w_ih_t + b_ih
        gh = h @ w_hh_t + b_hh
        r = jax.nn.sigmoid(gx[:, :H] + gh[:, :H])
        z = jax.nn.sigmoid(gx[:, H:2 * H] + gh[:, H:2 * H])
        n = jnp.tanh(gx[:, 2 * H:] + r * gh[:, 2 * H:])
        h = (1.0 - z) * n + z * h
        outs[t] = h
    return jnp.stack(outs, axis=0)


def ref_forward(sent1, sent2, params):
    emb = params["emb"]

    def encode(x_btd):
        x = jnp.transpose(x_btd, (1, 0, 2))
        for lf, lb in (("l0f", "l0b"), ("l1f", "l1b")):
            of = ref_gru_dir(x, *params[lf], reverse=False)
            ob = ref_gru_dir(x, *params[lb], reverse=True)
            x = jnp.concatenate([of, ob], axis=-1)
        return x[-1]

    e1 = encode(emb[sent1])
    e2 = encode(emb[sent2])
    logits = (e1 * e2) @ params["fc_w_t"] + params["fc_b"]
    probs = jax.nn.softmax(logits, axis=-1)
    return logits, probs


# -----------------------------------------------------------------------------
# Deterministic parameter init (shapes follow nn.GRU / nn.Linear / nn.Embedding)
# -----------------------------------------------------------------------------
def init_gru_dir_params(key, input_dim, hidden):
    k1, k2, k3, k4 = jax.random.split(key, 4)
    s = 1.0 / jnp.sqrt(hidden)
    w_ih = jax.random.uniform(k1, (3 * hidden, input_dim), jnp.float32, -s, s)
    w_hh = jax.random.uniform(k2, (3 * hidden, hidden), jnp.float32, -s, s)
    b_ih = jax.random.uniform(k3, (3 * hidden,), jnp.float32, -s, s)
    b_hh = jax.random.uniform(k4, (3 * hidden,), jnp.float32, -s, s)
    # store transposed for (x @ W^T) as (x @ W_t)
    return (w_ih.T, w_hh.T, b_ih, b_hh)


def make_params(key, vocab, embed_dim, hidden, num_labels):
    keys = jax.random.split(key, 7)
    emb = jax.random.normal(keys[0], (vocab, embed_dim), jnp.float32) * 0.1
    l0f = init_gru_dir_params(keys[1], embed_dim, hidden)
    l0b = init_gru_dir_params(keys[2], embed_dim, hidden)
    l1f = init_gru_dir_params(keys[3], 2 * hidden, hidden)
    l1b = init_gru_dir_params(keys[4], 2 * hidden, hidden)
    s = 1.0 / jnp.sqrt(2 * hidden)
    fc_w = jax.random.uniform(keys[5], (num_labels, 2 * hidden), jnp.float32, -s, s)
    fc_b = jax.random.uniform(keys[6], (num_labels,), jnp.float32, -s, s)
    return {
        "emb": emb,
        "l0f": l0f, "l0b": l0b, "l1f": l1f, "l1b": l1b,
        "fc_w_t": fc_w.T, "fc_b": fc_b,
    }


if __name__ == "__main__":
    B, T, D, H, L, VOCAB = 2, 16, 32, 32, 4, 100

    key = jax.random.PRNGKey(0)
    kp, k1, k2 = jax.random.split(key, 3)
    params = make_params(kp, VOCAB, D, H, L)
    sent1 = jax.random.randint(k1, (B, T), 0, VOCAB, dtype=jnp.int32)
    sent2 = jax.random.randint(k2, (B, T), 0, VOCAB, dtype=jnp.int32)

    ref_logits, ref_probs = ref_forward(sent1, sent2, params)

    # f32 path, time_chunk=4 -> 4 grid steps: exercises the scratch-carried
    # hidden state and the reversed-chunk backward writeback.  Tight check.
    fwd_f32 = jax.jit(functools.partial(
        bigru_forward, params=params, time_chunk=4,
        compute_dtype=jnp.float32))
    logits, probs = fwd_f32(sent1, sent2)
    jax.block_until_ready((logits, probs))
    assert jnp.allclose(logits, ref_logits, atol=1e-4, rtol=1e-4)
    assert jnp.allclose(probs, ref_probs, atol=1e-4, rtol=1e-4)

    # bf16 production path (halved HBM/VMEM traffic, native MXU rate).  Loose
    # tolerance appropriate for bf16 storage of the gate projections.
    fwd_bf16 = jax.jit(functools.partial(
        bigru_forward, params=params, time_chunk=4,
        compute_dtype=jnp.bfloat16))
    logits16, probs16 = fwd_bf16(sent1, sent2)
    jax.block_until_ready((logits16, probs16))
    assert bool(jnp.all(jnp.isfinite(logits16)))
    assert bool(jnp.all(jnp.isfinite(probs16)))
    assert jnp.allclose(logits16, ref_logits, atol=5e-2, rtol=5e-2)
    assert jnp.allclose(probs16, ref_probs, atol=5e-2, rtol=5e-2)

    print("KERNEL_OK")
</pallas_src>

<mosaic_0001>
module attributes {stable_mosaic.version = 11 : i64} {
  func.func @bigru_layer0_kernel(%arg0: i32, %arg1: memref<4x4x96xf32, #tpu.memory_space<vmem>>, %arg2: memref<4x4x96xf32, #tpu.memory_space<vmem>>, %arg3: memref<2x32x96xf32, #tpu.memory_space<vmem>>, %arg4: memref<2x1x32xf32, #tpu.memory_space<vmem>>, %arg5: memref<4x4x32xf32, #tpu.memory_space<vmem>>, %arg6: memref<4x4x32xf32, #tpu.memory_space<vmem>>, %arg7: memref<4x32xf32, #tpu.memory_space<vmem>>, %arg8: memref<4x32xf32, #tpu.memory_space<vmem>>) attributes {dimension_semantics = [#tpu.dimension_semantics<arbitrary>], iteration_bounds = array<i64: 4>, scalar_prefetch = 0 : i64, scratch_operands = 2 : i64, tpu.core_type = #tpu.core_type<tc>, window_params = [{transform_indices = @transform_0, window_bounds = array<i64: 4, 4, 96>}, {transform_indices = @transform_1, window_bounds = array<i64: 4, 4, 96>}, {pipeline_mode = #tpu.pipeline_mode<synchronous>, transform_indices = @transform_2, window_bounds = array<i64: 2, 32, 96>}, {pipeline_mode = #tpu.pipeline_mode<synchronous>, transform_indices = @transform_3, window_bounds = array<i64: 2, 1, 32>}, {transform_indices = @transform_4, window_bounds = array<i64: 4, 4, 32>}, {transform_indices = @transform_5, window_bounds = array<i64: 4, 4, 32>}]} {
    %c0_i32 = arith.constant 0 : i32
    %0 = arith.cmpi eq, %arg0, %c0_i32 : i32
    %1 = arith.extui %0 : i1 to i32
    %c0_i32_0 = arith.constant 0 : i32
    %2 = arith.cmpi ne, %1, %c0_i32_0 : i32
    scf.if %2 {
      %cst_87 = arith.constant 0.000000e+00 : f32
      %299 = vector.broadcast %cst_87 : f32 to vector<4x32xf32>
      %c0_88 = arith.constant 0 : index
      %c0_89 = arith.constant 0 : index
      %300 = vector.load %arg7[%c0_88, %c0_89] : memref<4x32xf32, #tpu.memory_space<vmem>>, vector<4x32xf32>
      tpu.vector_store %arg7[%c0_88, %c0_89], %299 {strides = array<i32>} : memref<4x32xf32, #tpu.memory_space<vmem>>, vector<4x32xf32>,
      %cst_90 = arith.constant 0.000000e+00 : f32
      %301 = vector.broadcast %cst_90 : f32 to vector<4x32xf32>
      %c0_91 = arith.constant 0 : index
      %c0_92 = arith.constant 0 : index
      %302 = vector.load %arg8[%c0_91, %c0_92] : memref<4x32xf32, #tpu.memory_space<vmem>>, vector<4x32xf32>
      tpu.vector_store %arg8[%c0_91, %c0_92], %301 {strides = array<i32>} : memref<4x32xf32, #tpu.memory_space<vmem>>, vector<4x32xf32>,
    } else {
    }
    %c0 = arith.constant 0 : index
    %c0_1 = arith.constant 0 : index
    %c0_2 = arith.constant 0 : index
    %3 = vector.load %arg3[%c0, %c0_1, %c0_2] : memref<2x32x96xf32, #tpu.memory_space<vmem>>, vector<1x32x96xf32>
    %4 = vector.shape_cast %3 : vector<1x32x96xf32> to vector<32x96xf32>
    %c1 = arith.constant 1 : index
    %c0_3 = arith.constant 0 : index
    %c0_4 = arith.constant 0 : index
    %5 = vector.load %arg3[%c1, %c0_3, %c0_4] : memref<2x32x96xf32, #tpu.memory_space<vmem>>, vector<1x32x96xf32>
    %6 = vector.shape_cast %5 : vector<1x32x96xf32> to vector<32x96xf32>
    %c0_5 = arith.constant 0 : index
    %c0_6 = arith.constant 0 : index
    %c0_7 = arith.constant 0 : index
    %7 = vector.load %arg4[%c0_5, %c0_6, %c0_7] : memref<2x1x32xf32, #tpu.memory_space<vmem>>, vector<1x1x32xf32>
    %8 = vector.shape_cast %7 : vector<1x1x32xf32> to vector<1x32xf32>
    %c1_8 = arith.constant 1 : index
    %c0_9 = arith.constant 0 : index
    %c0_10 = arith.constant 0 : index
    %9 = vector.load %arg4[%c1_8, %c0_9, %c0_10] : memref<2x1x32xf32, #tpu.memory_space<vmem>>, vector<1x1x32xf32>
    %10 = vector.shape_cast %9 : vector<1x1x32xf32> to vector<1x32xf32>
    %c0_11 = arith.constant 0 : index
    %c0_12 = arith.constant 0 : index
    %11 = vector.load %arg7[%c0_11, %c0_12] : memref<4x32xf32, #tpu.memory_space<vmem>>, vector<4x32xf32>
    %c0_13 = arith.constant 0 : index
    %c0_14 = arith.constant 0 : index
    %12 = vector.load %arg8[%c0_13, %c0_14] : memref<4x32xf32, #tpu.memory_space<vmem>>, vector<4x32xf32>
    %c0_i32_15 = arith.constant 0 : i32
    %13 = arith.index_cast %c0_i32_15 : i32 to index
    %c0_16 = arith.constant 0 : index
    %c0_17 = arith.constant 0 : index
    %14 = vector.load %arg1[%13, %c0_16, %c0_17] : memref<4x4x96xf32, #tpu.memory_space<vmem>>, vector<1x4x96xf32>
    %15 = vector.shape_cast %14 : vector<1x4x96xf32> to vector<4x96xf32>
    %cst = arith.constant dense<0.000000e+00> : vector<4x96xf32>
    %16 = tpu.matmul %11, %4, %cst {dimension_numbers = #tpu.dot_dimension_numbers<[1], [0], [0], [1], [0, 0, 1, 1], [], []>} : vector<4x32xf32>, vector<32x96xf32>, vector<4x96xf32> -> vector<4x96xf32>
    %17 = vector.extract_strided_slice %15 {offsets = [0, 0], sizes = [4, 32], strides = [1, 1]} : vector<4x96xf32> to vector<4x32xf32>
    %18 = vector.extract_strided_slice %16 {offsets = [0, 0], sizes = [4, 32], strides = [1, 1]} : vector<4x96xf32> to vector<4x32xf32>
    %19 = arith.addf %17, %18 : vector<4x32xf32>
    %20 = arith.negf %19 : vector<4x32xf32>
    %21 = math.exp %20 : vector<4x32xf32>
    %cst_18 = arith.constant 1.000000e+00 : f32
    %22 = vector.broadcast %cst_18 : f32 to vector<4x32xf32>
    %23 = arith.addf %22, %21 : vector<4x32xf32>
    %24 = arith.divf %22, %23 : vector<4x32xf32>
    %25 = vector.extract_strided_slice %15 {offsets = [0, 32], sizes = [4, 32], strides = [1, 1]} : vector<4x96xf32> to vector<4x32xf32>
    %26 = vector.extract_strided_slice %16 {offsets = [0, 32], sizes = [4, 32], strides = [1, 1]} : vector<4x96xf32> to vector<4x32xf32>
    %27 = arith.addf %25, %26 : vector<4x32xf32>
    %28 = arith.negf %27 : vector<4x32xf32>
    %29 = math.exp %28 : vector<4x32xf32>
    %cst_19 = arith.constant 1.000000e+00 : f32
    %30 = vector.broadcast %cst_19 : f32 to vector<4x32xf32>
    %31 = arith.addf %30, %29 : vector<4x32xf32>
    %32 = arith.divf %30, %31 : vector<4x32xf32>
    %33 = vector.extract_strided_slice %15 {offsets = [0, 64], sizes = [4, 32], strides = [1, 1]} : vector<4x96xf32> to vector<4x32xf32>
    %34 = vector.extract_strided_slice %16 {offsets = [0, 64], sizes = [4, 32], strides = [1, 1]} : vector<4x96xf32> to vector<4x32xf32>
    %35 = vector.broadcast %8 : vector<1x32xf32> to vector<4x32xf32>
    %36 = arith.addf %34, %35 : vector<4x32xf32>
    %37 = arith.mulf %24, %36 : vector<4x32xf32>
    %38 = arith.addf %33, %37 : vector<4x32xf32>
    %39 = math.tanh %38 : vector<4x32xf32>
    %cst_20 = arith.constant 1.000000e+00 : f32
    %40 = vector.broadcast %cst_20 : f32 to vector<4x32xf32>
    %41 = arith.subf %40, %32 : vector<4x32xf32>
    %42 = arith.mulf %41, %39 : vector<4x32xf32>
    %43 = arith.mulf %32, %11 : vector<4x32xf32>
    %44 = arith.addf %42, %43 : vector<4x32xf32>
    %45 = arith.index_cast %c0_i32_15 : i32 to index
    %c0_21 = arith.constant 0 : index
    %c0_22 = arith.constant 0 : index
    %46 = vector.load %arg2[%45, %c0_21, %c0_22] : memref<4x4x96xf32, #tpu.memory_space<vmem>>, vector<1x4x96xf32>
    %47 = vector.shape_cast %46 : vector<1x4x96xf32> to vector<4x96xf32>
    %cst_23 = arith.constant dense<0.000000e+00> : vector<4x96xf32>
    %48 = tpu.matmul %12, %6, %cst_23 {dimension_numbers = #tpu.dot_dimension_numbers<[1], [0], [0], [1], [0, 0, 1, 1], [], []>} : vector<4x32xf32>, vector<32x96xf32>, vector<4x96xf32> -> vector<4x96xf32>
    %49 = vector.extract_strided_slice %47 {offsets = [0, 0], sizes = [4, 32], strides = [1, 1]} : vector<4x96xf32> to vector<4x32xf32>
    %50 = vector.extract_strided_slice %48 {offsets = [0, 0], sizes = [4, 32], strides = [1, 1]} : vector<4x96xf32> to vector<4x32xf32>
    %51 = arith.addf %49, %50 : vector<4x32xf32>
    %52 = arith.negf %51 : vector<4x32xf32>
    %53 = math.exp %52 : vector<4x32xf32>
    %cst_24 = arith.constant 1.000000e+00 : f32
    %54 = vector.broadcast %cst_24 : f32 to vector<4x32xf32>
    %55 = arith.addf %54, %53 : vector<4x32xf32>
    %56 = arith.divf %54, %55 : vector<4x32xf32>
    %57 = vector.extract_strided_slice %47 {offsets = [0, 32], sizes = [4, 32], strides = [1, 1]} : vector<4x96xf32> to vector<4x32xf32>
    %58 = vector.extract_strided_slice %48 {offsets = [0, 32], sizes = [4, 32], strides = [1, 1]} : vector<4x96xf32> to vector<4x32xf32>
    %59 = arith.addf %57, %58 : vector<4x32xf32>
    %60 = arith.negf %59 : vector<4x32xf32>
    %61 = math.exp %60 : vector<4x32xf32>
    %cst_25 = arith.constant 1.000000e+00 : f32
    %62 = vector.broadcast %cst_25 : f32 to vector<4x32xf32>
    %63 = arith.addf %62, %61 : vector<4x32xf32>
    %64 = arith.divf %62, %63 : vector<4x32xf32>
    %65 = vector.extract_strided_slice %47 {offsets = [0, 64], sizes = [4, 32], strides = [1, 1]} : vector<4x96xf32> to vector<4x32xf32>
    %66 = vector.extract_strided_slice %48 {offsets = [0, 64], sizes = [4, 32], strides = [1, 1]} : vector<4x96xf32> to vector<4x32xf32>
    %67 = vector.broadcast %10 : vector<1x32xf32> to vector<4x32xf32>
    %68 = arith.addf %66, %67 : vector<4x32xf32>
    %69 = arith.mulf %56, %68 : vector<4x32xf32>
    %70 = arith.addf %65, %69 : vector<4x32xf32>
    %71 = math.tanh %70 : vector<4x32xf32>
    %cst_26 = arith.constant 1.000000e+00 : f32
    %72 = vector.broadcast %cst_26 : f32 to vector<4x32xf32>
    %73 = arith.subf %72, %64 : vector<4x32xf32>
    %74 = arith.mulf %73, %71 : vector<4x32xf32>
    %75 = arith.mulf %64, %12 : vector<4x32xf32>
    %76 = arith.addf %74, %75 : vector<4x32xf32>
    %77 = vector.shape_cast %44 : vector<4x32xf32> to vector<1x4x32xf32>
    %78 = arith.index_cast %c0_i32_15 : i32 to index
    %c0_27 = arith.constant 0 : index
    %c0_28 = arith.constant 0 : index
    %79 = vector.load %arg5[%78, %c0_27, %c0_28] : memref<4x4x32xf32, #tpu.memory_space<vmem>>, vector<1x4x32xf32>
    tpu.vector_store %arg5[%78, %c0_27, %c0_28], %77 {strides = array<i32>} : memref<4x4x32xf32, #tpu.memory_space<vmem>>, vector<1x4x32xf32>,
    %80 = vector.shape_cast %76 : vector<4x32xf32> to vector<1x4x32xf32>
    %c3_i32 = arith.constant 3 : i32
    %81 = arith.subi %c3_i32, %c0_i32_15 : i32
    %82 = arith.index_cast %81 : i32 to index
    %c0_29 = arith.constant 0 : index
    %c0_30 = arith.constant 0 : index
    %83 = vector.load %arg6[%82, %c0_29, %c0_30] : memref<4x4x32xf32, #tpu.memory_space<vmem>>, vector<1x4x32xf32>
    tpu.vector_store %arg6[%82, %c0_29, %c0_30], %80 {strides = array<i32>} : memref<4x4x32xf32, #tpu.memory_space<vmem>>, vector<1x4x32xf32>,
    %c1_i32 = arith.constant 1 : i32
    %84 = arith.index_cast %c1_i32 : i32 to index
    %c0_31 = arith.constant 0 : index
    %c0_32 = arith.constant 0 : index
    %85 = vector.load %arg1[%84, %c0_31, %c0_32] : memref<4x4x96xf32, #tpu.memory_space<vmem>>, vector<1x4x96xf32>
    %86 = vector.shape_cast %85 : vector<1x4x96xf32> to vector<4x96xf32>
    %cst_33 = arith.constant dense<0.000000e+00> : vector<4x96xf32>
    %87 = tpu.matmul %44, %4, %cst_33 {dimension_numbers = #tpu.dot_dimension_numbers<[1], [0], [0], [1], [0, 0, 1, 1], [], []>} : vector<4x32xf32>, vector<32x96xf32>, vector<4x96xf32> -> vector<4x96xf32>
    %88 = vector.extract_strided_slice %86 {offsets = [0, 0], sizes = [4, 32], strides = [1, 1]} : vector<4x96xf32> to vector<4x32xf32>
    %89 = vector.extract_strided_slice %87 {offsets = [0, 0], sizes = [4, 32], strides = [1, 1]} : vector<4x96xf32> to vector<4x32xf32>
    %90 = arith.addf %88, %89 : vector<4x32xf32>
    %91 = arith.negf %90 : vector<4x32xf32>
    %92 = math.exp %91 : vector<4x32xf32>
    %cst_34 = arith.constant 1.000000e+00 : f32
    %93 = vector.broadcast %cst_34 : f32 to vector<4x32xf32>
    %94 = arith.addf %93, %92 : vector<4x32xf32>
    %95 = arith.divf %93, %94 : vector<4x32xf32>
    %96 = vector.extract_strided_slice %86 {offsets = [0, 32], sizes = [4, 32], strides = [1, 1]} : vector<4x96xf32> to vector<4x32xf32>
    %97 = vector.extract_strided_slice %87 {offsets = [0, 32], sizes = [4, 32], strides = [1, 1]} : vector<4x96xf32> to vector<4x32xf32>
    %98 = arith.addf %96, %97 : vector<4x32xf32>
    %99 = arith.negf %98 : vector<4x32xf32>
    %100 = math.exp %99 : vector<4x32xf32>
    %cst_35 = arith.constant 1.000000e+00 : f32
    %101 = vector.broadcast %cst_35 : f32 to vector<4x32xf32>
    %102 = arith.addf %101, %100 : vector<4x32xf32>
    %103 = arith.divf %101, %102 : vector<4x32xf32>
    %104 = vector.extract_strided_slice %86 {offsets = [0, 64], sizes = [4, 32], strides = [1, 1]} : vector<4x96xf32> to vector<4x32xf32>
    %105 = vector.extract_strided_slice %87 {offsets = [0, 64], sizes = [4, 32], strides = [1, 1]} : vector<4x96xf32> to vector<4x32xf32>
    %106 = vector.broadcast %8 : vector<1x32xf32> to vector<4x32xf32>
    %107 = arith.addf %105, %106 : vector<4x32xf32>
    %108 = arith.mulf %95, %107 : vector<4x32xf32>
    %109 = arith.addf %104, %108 : vector<4x32xf32>
    %110 = math.tanh %109 : vector<4x32xf32>
    %cst_36 = arith.constant 1.000000e+00 : f32
    %111 = vector.broadcast %cst_36 : f32 to vector<4x32xf32>
    %112 = arith.subf %111, %103 : vector<4x32xf32>
    %113 = arith.mulf %112, %110 : vector<4x32xf32>
    %114 = arith.mulf %103, %44 : vector<4x32xf32>
    %115 = arith.addf %113, %114 : vector<4x32xf32>
    %116 = arith.index_cast %c1_i32 : i32 to index
    %c0_37 = arith.constant 0 : index
    %c0_38 = arith.constant 0 : index
    %117 = vector.load %arg2[%116, %c0_37, %c0_38] : memref<4x4x96xf32, #tpu.memory_space<vmem>>, vector<1x4x96xf32>
    %118 = vector.shape_cast %117 : vector<1x4x96xf32> to vector<4x96xf32>
    %cst_39 = arith.constant dense<0.000000e+00> : vector<4x96xf32>
    %119 = tpu.matmul %76, %6, %cst_39 {dimension_numbers = #tpu.dot_dimension_numbers<[1], [0], [0], [1], [0, 0, 1, 1], [], []>} : vector<4x32xf32>, vector<32x96xf32>, vector<4x96xf32> -> vector<4x96xf32>
    %120 = vector.extract_strided_slice %118 {offsets = [0, 0], sizes = [4, 32], strides = [1, 1]} : vector<4x96xf32> to vector<4x32xf32>
    %121 = vector.extract_strided_slice %119 {offsets = [0, 0], sizes = [4, 32], strides = [1, 1]} : vector<4x96xf32> to vector<4x32xf32>
    %122 = arith.addf %120, %121 : vector<4x32xf32>
    %123 = arith.negf %122 : vector<4x32xf32>
    %124 = math.exp %123 : vector<4x32xf32>
    %cst_40 = arith.constant 1.000000e+00 : f32
    %125 = vector.broadcast %cst_40 : f32 to vector<4x32xf32>
    %126 = arith.addf %125, %124 : vector<4x32xf32>
    %127 = arith.divf %125, %126 : vector<4x32xf32>
    %128 = vector.extract_strided_slice %118 {offsets = [0, 32], sizes = [4, 32], strides = [1, 1]} : vector<4x96xf32> to vector<4x32xf32>
    %129 = vector.extract_strided_slice %119 {offsets = [0, 32], sizes = [4, 32], strides = [1, 1]} : vector<4x96xf32> to vector<4x32xf32>
    %130 = arith.addf %128, %129 : vector<4x32xf32>
    %131 = arith.negf %130 : vector<4x32xf32>
    %132 = math.exp %131 : vector<4x32xf32>
    %cst_41 = arith.constant 1.000000e+00 : f32
    %133 = vector.broadcast %cst_41 : f32 to vector<4x32xf32>
    %134 = arith.addf %133, %132 : vector<4x32xf32>
    %135 = arith.divf %133, %134 : vector<4x32xf32>
    %136 = vector.extract_strided_slice %118 {offsets = [0, 64], sizes = [4, 32], strides = [1, 1]} : vector<4x96xf32> to vector<4x32xf32>
    %137 = vector.extract_strided_slice %119 {offsets = [0, 64], sizes = [4, 32], strides = [1, 1]} : vector<4x96xf32> to vector<4x32xf32>
    %138 = vector.broadcast %10 : vector<1x32xf32> to vector<4x32xf32>
    %139 = arith.addf %137, %138 : vector<4x32xf32>
    %140 = arith.mulf %127, %139 : vector<4x32xf32>
    %141 = arith.addf %136, %140 : vector<4x32xf32>
    %142 = math.tanh %141 : vector<4x32xf32>
    %cst_42 = arith.constant 1.000000e+00 : f32
    %143 = vector.broadcast %cst_42 : f32 to vector<4x32xf32>
    %144 = arith.subf %143, %135 : vector<4x32xf32>
    %145 = arith.mulf %144, %142 : vector<4x32xf32>
    %146 = arith.mulf %135, %76 : vector<4x32xf32>
    %147 = arith.addf %145, %146 : vector<4x32xf32>
    %148 = vector.shape_cast %115 : vector<4x32xf32> to vector<1x4x32xf32>
    %149 = arith.index_cast %c1_i32 : i32 to index
    %c0_43 = arith.constant 0 : index
    %c0_44 = arith.constant 0 : index
    %150 = vector.load %arg5[%149, %c0_43, %c0_44] : memref<4x4x32xf32, #tpu.memory_space<vmem>>, vector<1x4x32xf32>
    tpu.vector_store %arg5[%149, %c0_43, %c0_44], %148 {strides = array<i32>} : memref<4x4x32xf32, #tpu.memory_space<vmem>>, vector<1x4x32xf32>,
    %151 = vector.shape_cast %147 : vector<4x32xf32> to vector<1x4x32xf32>
    %c3_i32_45 = arith.constant 3 : i32
    %152 = arith.subi %c3_i32_45, %c1_i32 : i32
    %153 = arith.index_cast %152 : i32 to index
    %c0_46 = arith.constant 0 : index
    %c0_47 = arith.constant 0 : index
    %154 = vector.load %arg6[%153, %c0_46, %c0_47] : memref<4x4x32xf32, #tpu.memory_space<vmem>>, vector<1x4x32xf32>
    tpu.vector_store %arg6[%153, %c0_46, %c0_47], %151 {strides = array<i32>} : memref<4x4x32xf32, #tpu.memory_space<vmem>>, vector<1x4x32xf32>,
    %c2_i32 = arith.constant 2 : i32
    %155 = arith.index_cast %c2_i32 : i32 to index
    %c0_48 = arith.constant 0 : index
    %c0_49 = arith.constant 0 : index
    %156 = vector.load %arg1[%155, %c0_48, %c0_49] : memref<4x4x96xf32, #tpu.memory_space<vmem>>, vector<1x4x96xf32>
    %157 = vector.shape_cast %156 : vector<1x4x96xf32> to vector<4x96xf32>
    %cst_50 = arith.constant dense<0.000000e+00> : vector<4x96xf32>
    %158 = tpu.matmul %115, %4, %cst_50 {dimension_numbers = #tpu.dot_dimension_numbers<[1], [0], [0], [1], [0, 0, 1, 1], [], []>} : vector<4x32xf32>, vector<32x96xf32>, vector<4x96xf32> -> vector<4x96xf32>
    %159 = vector.extract_strided_slice %157 {offsets = [0, 0], sizes = [4, 32], strides = [1, 1]} : vector<4x96xf32> to vector<4x32xf32>
    %160 = vector.extract_strided_slice %158 {offsets = [0, 0], sizes = [4, 32], strides = [1, 1]} : vector<4x96xf32> to vector<4x32xf32>
    %161 = arith.addf %159, %160 : vector<4x32xf32>
    %162 = arith.negf %161 : vector<4x32xf32>
    %163 = math.exp %162 : vector<4x32xf32>
    %cst_51 = arith.constant 1.000000e+00 : f32
    %164 = vector.broadcast %cst_51 : f32 to vector<4x32xf32>
    %165 = arith.addf %164, %163 : vector<4x32xf32>
    %166 = arith.divf %164, %165 : vector<4x32xf32>
    %167 = vector.extract_strided_slice %157 {offsets = [0, 32], sizes = [4, 32], strides = [1, 1]} : vector<4x96xf32> to vector<4x32xf32>
    %168 = vector.extract_strided_slice %158 {offsets = [0, 32], sizes = [4, 32], strides = [1, 1]} : vector<4x96xf32> to vector<4x32xf32>
    %169 = arith.addf %167, %168 : vector<4x32xf32>
    %170 = arith.negf %169 : vector<4x32xf32>
    %171 = math.exp %170 : vector<4x32xf32>
    %cst_52 = arith.constant 1.000000e+00 : f32
    %172 = vector.broadcast %cst_52 : f32 to vector<4x32xf32>
    %173 = arith.addf %172, %171 : vector<4x32xf32>
    %174 = arith.divf %172, %173 : vector<4x32xf32>
    %175 = vector.extract_strided_slice %157 {offsets = [0, 64], sizes = [4, 32], strides = [1, 1]} : vector<4x96xf32> to vector<4x32xf32>
    %176 = vector.extract_strided_slice %158 {offsets = [0, 64], sizes = [4, 32], strides = [1, 1]} : vector<4x96xf32> to vector<4x32xf32>
    %177 = vector.broadcast %8 : vector<1x32xf32> to vector<4x32xf32>
    %178 = arith.addf %176, %177 : vector<4x32xf32>
    %179 = arith.mulf %166, %178 : vector<4x32xf32>
    %180 = arith.addf %175, %179 : vector<4x32xf32>
    %181 = math.tanh %180 : vector<4x32xf32>
    %cst_53 = arith.constant 1.000000e+00 : f32
    %182 = vector.broadcast %cst_53 : f32 to vector<4x32xf32>
    %183 = arith.subf %182, %174 : vector<4x32xf32>
    %184 = arith.mulf %183, %181 : vector<4x32xf32>
    %185 = arith.mulf %174, %115 : vector<4x32xf32>
    %186 = arith.addf %184, %185 : vector<4x32xf32>
    %187 = arith.index_cast %c2_i32 : i32 to index
    %c0_54 = arith.constant 0 : index
    %c0_55 = arith.constant 0 : index
    %188 = vector.load %arg2[%187, %c0_54, %c0_55] : memref<4x4x96xf32, #tpu.memory_space<vmem>>, vector<1x4x96xf32>
    %189 = vector.shape_cast %188 : vector<1x4x96xf32> to vector<4x96xf32>
    %cst_56 = arith.constant dense<0.000000e+00> : vector<4x96xf32>
    %190 = tpu.matmul %147, %6, %cst_56 {dimension_numbers = #tpu.dot_dimension_numbers<[1], [0], [0], [1], [0, 0, 1, 1], [], []>} : vector<4x32xf32>, vector<32x96xf32>, vector<4x96xf32> -> vector<4x96xf32>
    %191 = vector.extract_strided_slice %189 {offsets = [0, 0], sizes = [4, 32], strides = [1, 1]} : vector<4x96xf32> to vector<4x32xf32>
    %192 = vector.extract_strided_slice %190 {offsets = [0, 0], sizes = [4, 32], strides = [1, 1]} : vector<4x96xf32> to vector<4x32xf32>
    %193 = arith.addf %191, %192 : vector<4x32xf32>
    %194 = arith.negf %193 : vector<4x32xf32>
    %195 = math.exp %194 : vector<4x32xf32>
    %cst_57 = arith.constant 1.000000e+00 : f32
    %196 = vector.broadcast %cst_57 : f32 to vector<4x32xf32>
    %197 = arith.addf %196, %195 : vector<4x32xf32>
    %198 = arith.divf %196, %197 : vector<4x32xf32>
    %199 = vector.extract_strided_slice %189 {offsets = [0, 32], sizes = [4, 32], strides = [1, 1]} : vector<4x96xf32> to vector<4x32xf32>
    %200 = vector.extract_strided_slice %190 {offsets = [0, 32], sizes = [4, 32], strides = [1, 1]} : vector<4x96xf32> to vector<4x32xf32>
    %201 = arith.addf %199, %200 : vector<4x32xf32>
    %202 = arith.negf %201 : vector<4x32xf32>
    %203 = math.exp %202 : vector<4x32xf32>
    %cst_58 = arith.constant 1.000000e+00 : f32
    %204 = vector.broadcast %cst_58 : f32 to vector<4x32xf32>
    %205 = arith.addf %204, %203 : vector<4x32xf32>
    %206 = arith.divf %204, %205 : vector<4x32xf32>
    %207 = vector.extract_strided_slice %189 {offsets = [0, 64], sizes = [4, 32], strides = [1, 1]} : vector<4x96xf32> to vector<4x32xf32>
    %208 = vector.extract_strided_slice %190 {offsets = [0, 64], sizes = [4, 32], strides = [1, 1]} : vector<4x96xf32> to vector<4x32xf32>
    %209 = vector.broadcast %10 : vector<1x32xf32> to vector<4x32xf32>
    %210 = arith.addf %208, %209 : vector<4x32xf32>
    %211 = arith.mulf %198, %210 : vector<4x32xf32>
    %212 = arith.addf %207, %211 : vector<4x32xf32>
    %213 = math.tanh %212 : vector<4x32xf32>
    %cst_59 = arith.constant 1.000000e+00 : f32
    %214 = vector.broadcast %cst_59 : f32 to vector<4x32xf32>
    %215 = arith.subf %214, %206 : vector<4x32xf32>
    %216 = arith.mulf %215, %213 : vector<4x32xf32>
    %217 = arith.mulf %206, %147 : vector<4x32xf32>
    %218 = arith.addf %216, %217 : vector<4x32xf32>
    %219 = vector.shape_cast %186 : vector<4x32xf32> to vector<1x4x32xf32>
    %220 = arith.index_cast %c2_i32 : i32 to index
    %c0_60 = arith.constant 0 : index
    %c0_61 = arith.constant 0 : index
    %221 = vector.load %arg5[%220, %c0_60, %c0_61] : memref<4x4x32xf32, #tpu.memory_space<vmem>>, vector<1x4x32xf32>
    tpu.vector_store %arg5[%220, %c0_60, %c0_61], %219 {strides = array<i32>} : memref<4x4x32xf32, #tpu.memory_space<vmem>>, vector<1x4x32xf32>,
    %222 = vector.shape_cast %218 : vector<4x32xf32> to vector<1x4x32xf32>
    %c3_i32_62 = arith.constant 3 : i32
    %223 = arith.subi %c3_i32_62, %c2_i32 : i32
    %224 = arith.index_cast %223 : i32 to index
    %c0_63 = arith.constant 0 : index
    %c0_64 = arith.constant 0 : index
    %225 = vector.load %arg6[%224, %c0_63, %c0_64] : memref<4x4x32xf32, #tpu.memory_space<vmem>>, vector<1x4x32xf32>
    tpu.vector_store %arg6[%224, %c0_63, %c0_64], %222 {strides = array<i32>} : memref<4x4x32xf32, #tpu.memory_space<vmem>>, vector<1x4x32xf32>,
    %c3_i32_65 = arith.constant 3 : i32
    %226 = arith.index_cast %c3_i32_65 : i32 to index
    %c0_66 = arith.constant 0 : index
    %c0_67 = arith.constant 0 : index
    %227 = vector.load %arg1[%226, %c0_66, %c0_67] : memref<4x4x96xf32, #tpu.memory_space<vmem>>, vector<1x4x96xf32>
    %228 = vector.shape_cast %227 : vector<1x4x96xf32> to vector<4x96xf32>
    %cst_68 = arith.constant dense<0.000000e+00> : vector<4x96xf32>
    %229 = tpu.matmul %186, %4, %cst_68 {dimension_numbers = #tpu.dot_dimension_numbers<[1], [0], [0], [1], [0, 0, 1, 1], [], []>} : vector<4x32xf32>, vector<32x96xf32>, vector<4x96xf32> -> vector<4x96xf32>
    %230 = vector.extract_strided_slice %228 {offsets = [0, 0], sizes = [4, 32], strides = [1, 1]} : vector<4x96xf32> to vector<4x32xf32>
    %231 = vector.extract_strided_slice %229 {offsets = [0, 0], sizes = [4, 32], strides = [1, 1]} : vector<4x96xf32> to vector<4x32xf32>
    %232 = arith.addf %230, %231 : vector<4x32xf32>
    %233 = arith.negf %232 : vector<4x32xf32>
    %234 = math.exp %233 : vector<4x32xf32>
    %cst_69 = arith.constant 1.000000e+00 : f32
    %235 = vector.broadcast %cst_69 : f32 to vector<4x32xf32>
    %236 = arith.addf %235, %234 : vector<4x32xf32>
    %237 = arith.divf %235, %236 : vector<4x32xf32>
    %238 = vector.extract_strided_slice %228 {offsets = [0, 32], sizes = [4, 32], strides = [1, 1]} : vector<4x96xf32> to vector<4x32xf32>
    %239 = vector.extract_strided_slice %229 {offsets = [0, 32], sizes = [4, 32], strides = [1, 1]} : vector<4x96xf32> to vector<4x32xf32>
    %240 = arith.addf %238, %239 : vector<4x32xf32>
    %241 = arith.negf %240 : vector<4x32xf32>
    %242 = math.exp %241 : vector<4x32xf32>
    %cst_70 = arith.constant 1.000000e+00 : f32
    %243 = vector.broadcast %cst_70 : f32 to vector<4x32xf32>
    %244 = arith.addf %243, %242 : vector<4x32xf32>
    %245 = arith.divf %243, %244 : vector<4x32xf32>
    %246 = vector.extract_strided_slice %228 {offsets = [0, 64], sizes = [4, 32], strides = [1, 1]} : vector<4x96xf32> to vector<4x32xf32>
    %247 = vector.extract_strided_slice %229 {offsets = [0, 64], sizes = [4, 32], strides = [1, 1]} : vector<4x96xf32> to vector<4x32xf32>
    %248 = vector.broadcast %8 : vector<1x32xf32> to vector<4x32xf32>
    %249 = arith.addf %247, %248 : vector<4x32xf32>
    %250 = arith.mulf %237, %249 : vector<4x32xf32>
    %251 = arith.addf %246, %250 : vector<4x32xf32>
    %252 = math.tanh %251 : vector<4x32xf32>
    %cst_71 = arith.constant 1.000000e+00 : f32
    %253 = vector.broadcast %cst_71 : f32 to vector<4x32xf32>
    %254 = arith.subf %253, %245 : vector<4x32xf32>
    %255 = arith.mulf %254, %252 : vector<4x32xf32>
    %256 = arith.mulf %245, %186 : vector<4x32xf32>
    %257 = arith.addf %255, %256 : vector<4x32xf32>
    %258 = arith.index_cast %c3_i32_65 : i32 to index
    %c0_72 = arith.constant 0 : index
    %c0_73 = arith.constant 0 : index
    %259 = vector.load %arg2[%258, %c0_72, %c0_73] : memref<4x4x96xf32, #tpu.memory_space<vmem>>, vector<1x4x96xf32>
    %260 = vector.shape_cast %259 : vector<1x4x96xf32> to vector<4x96xf32>
    %cst_74 = arith.constant dense<0.000000e+00> : vector<4x96xf32>
    %261 = tpu.matmul %218, %6, %cst_74 {dimension_numbers = #tpu.dot_dimension_numbers<[1], [0], [0], [1], [0, 0, 1, 1], [], []>} : vector<4x32xf32>, vector<32x96xf32>, vector<4x96xf32> -> vector<4x96xf32>
    %262 = vector.extract_strided_slice %260 {offsets = [0, 0], sizes = [4, 32], strides = [1, 1]} : vector<4x96xf32> to vector<4x32xf32>
    %263 = vector.extract_strided_slice %261 {offsets = [0, 0], sizes = [4, 32], strides = [1, 1]} : vector<4x96xf32> to vector<4x32xf32>
    %264 = arith.addf %262, %263 : vector<4x32xf32>
    %265 = arith.negf %264 : vector<4x32xf32>
    %266 = math.exp %265 : vector<4x32xf32>
    %cst_75 = arith.constant 1.000000e+00 : f32
    %267 = vector.broadcast %cst_75 : f32 to vector<4x32xf32>
    %268 = arith.addf %267, %266 : vector<4x32xf32>
    %269 = arith.divf %267, %268 : vector<4x32xf32>
    %270 = vector.extract_strided_slice %260 {offsets = [0, 32], sizes = [4, 32], strides = [1, 1]} : vector<4x96xf32> to vector<4x32xf32>
    %271 = vector.extract_strided_slice %261 {offsets = [0, 32], sizes = [4, 32], strides = [1, 1]} : vector<4x96xf32> to vector<4x32xf32>
    %272 = arith.addf %270, %271 : vector<4x32xf32>
    %273 = arith.negf %272 : vector<4x32xf32>
    %274 = math.exp %273 : vector<4x32xf32>
    %cst_76 = arith.constant 1.000000e+00 : f32
    %275 = vector.broadcast %cst_76 : f32 to vector<4x32xf32>
    %276 = arith.addf %275, %274 : vector<4x32xf32>
    %277 = arith.divf %275, %276 : vector<4x32xf32>
    %278 = vector.extract_strided_slice %260 {offsets = [0, 64], sizes = [4, 32], strides = [1, 1]} : vector<4x96xf32> to vector<4x32xf32>
    %279 = vector.extract_strided_slice %261 {offsets = [0, 64], sizes = [4, 32], strides = [1, 1]} : vector<4x96xf32> to vector<4x32xf32>
    %280 = vector.broadcast %10 : vector<1x32xf32> to vector<4x32xf32>
    %281 = arith.addf %279, %280 : vector<4x32xf32>
    %282 = arith.mulf %269, %281 : vector<4x32xf32>
    %283 = arith.addf %278, %282 : vector<4x32xf32>
    %284 = math.tanh %283 : vector<4x32xf32>
    %cst_77 = arith.constant 1.000000e+00 : f32
    %285 = vector.broadcast %cst_77 : f32 to vector<4x32xf32>
    %286 = arith.subf %285, %277 : vector<4x32xf32>
    %287 = arith.mulf %286, %284 : vector<4x32xf32>
    %288 = arith.mulf %277, %218 : vector<4x32xf32>
    %289 = arith.addf %287, %288 : vector<4x32xf32>
    %290 = vector.shape_cast %257 : vector<4x32xf32> to vector<1x4x32xf32>
    %291 = arith.index_cast %c3_i32_65 : i32 to index
    %c0_78 = arith.constant 0 : index
    %c0_79 = arith.constant 0 : index
    %292 = vector.load %arg5[%291, %c0_78, %c0_79] : memref<4x4x32xf32, #tpu.memory_space<vmem>>, vector<1x4x32xf32>
    tpu.vector_store %arg5[%291, %c0_78, %c0_79], %290 {strides = array<i32>} : memref<4x4x32xf32, #tpu.memory_space<vmem>>, vector<1x4x32xf32>,
    %293 = vector.shape_cast %289 : vector<4x32xf32> to vector<1x4x32xf32>
    %c3_i32_80 = arith.constant 3 : i32
    %294 = arith.subi %c3_i32_80, %c3_i32_65 : i32
    %295 = arith.index_cast %294 : i32 to index
    %c0_81 = arith.constant 0 : index
    %c0_82 = arith.constant 0 : index
    %296 = vector.load %arg6[%295, %c0_81, %c0_82] : memref<4x4x32xf32, #tpu.memory_space<vmem>>, vector<1x4x32xf32>
    tpu.vector_store %arg6[%295, %c0_81, %c0_82], %293 {strides = array<i32>} : memref<4x4x32xf32, #tpu.memory_space<vmem>>, vector<1x4x32xf32>,
    %c4_i32 = arith.constant 4 : i32
    %c0_83 = arith.constant 0 : index
    %c0_84 = arith.constant 0 : index
    %297 = vector.load %arg7[%c0_83, %c0_84] : memref<4x32xf32, #tpu.memory_space<vmem>>, vector<4x32xf32>
    tpu.vector_store %arg7[%c0_83, %c0_84], %257 {strides = array<i32>} : memref<4x32xf32, #tpu.memory_space<vmem>>, vector<4x32xf32>,
    %c0_85 = arith.constant 0 : index
    %c0_86 = arith.constant 0 : index
    %298 = vector.load %arg8[%c0_85, %c0_86] : memref<4x32xf32, #tpu.memory_space<vmem>>, vector<4x32xf32>
    tpu.vector_store %arg8[%c0_85, %c0_86], %289 {strides = array<i32>} : memref<4x32xf32, #tpu.memory_space<vmem>>, vector<4x32xf32>,
    return
  }
  func.func @transform_0(%arg0: i32) -> (i32, i32, i32) {
    %c0_i32 = arith.constant 0 : i32
    %c0_i32_0 = arith.constant 0 : i32
    %c0_i32_1 = arith.constant 0 : i32
    return %arg0, %c0_i32, %c0_i32_0 : i32, i32, i32
  }
  func.func @transform_1(%arg0: i32) -> (i32, i32, i32) {
    %c0_i32 = arith.constant 0 : i32
    %c0_i32_0 = arith.constant 0 : i32
    %c0_i32_1 = arith.constant 0 : i32
    return %arg0, %c0_i32, %c0_i32_0 : i32, i32, i32
  }
  func.func @transform_2(%arg0: i32) -> (i32, i32, i32) {
    %c0_i32 = arith.constant 0 : i32
    %c0_i32_0 = arith.constant 0 : i32
    %c0_i32_1 = arith.constant 0 : i32
    %c0_i32_2 = arith.constant 0 : i32
    return %c0_i32, %c0_i32_0, %c0_i32_1 : i32, i32, i32
  }
  func.func @transform_3(%arg0: i32) -> (i32, i32, i32) {
    %c0_i32 = arith.constant 0 : i32
    %c0_i32_0 = arith.constant 0 : i32
    %c0_i32_1 = arith.constant 0 : i32
    %c0_i32_2 = arith.constant 0 : i32
    return %c0_i32, %c0_i32_0, %c0_i32_1 : i32, i32, i32
  }
  func.func @transform_4(%arg0: i32) -> (i32, i32, i32) {
    %c0_i32 = arith.constant 0 : i32
    %c0_i32_0 = arith.constant 0 : i32
    %c0_i32_1 = arith.constant 0 : i32
    return %arg0, %c0_i32, %c0_i32_0 : i32, i32, i32
  }
  func.func @transform_5(%arg0: i32) -> (i32, i32, i32) {
    %c3_i32 = arith.constant 3 : i32
    %0 = arith.subi %c3_i32, %arg0 : i32
    %c0_i32 = arith.constant 0 : i32
    %c0_i32_0 = arith.constant 0 : i32
    %c0_i32_1 = arith.constant 0 : i32
    return %0, %c0_i32, %c0_i32_0 : i32, i32, i32
  }
}

module attributes {stable_mosaic.version = 11 : i64} {
  func.func @layer1_head_kernel(%arg0: i32, %arg1: memref<4x4x96xf32, #tpu.memory_space<vmem>>, %arg2: memref<4x96xf32, #tpu.memory_space<vmem>>, %arg3: memref<32x96xf32, #tpu.memory_space<vmem>>, %arg4: memref<1x32xf32, #tpu.memory_space<vmem>>, %arg5: memref<1x32xf32, #tpu.memory_space<vmem>>, %arg6: memref<64x4xf32, #tpu.memory_space<vmem>>, %arg7: memref<1x4xf32, #tpu.memory_space<vmem>>, %arg8: memref<2x4xf32, #tpu.memory_space<vmem>>, %arg9: memref<2x4xf32, #tpu.memory_space<vmem>>, %arg10: memref<4x32xf32, #tpu.memory_space<vmem>>) attributes {dimension_semantics = [#tpu.dimension_semantics<arbitrary>], iteration_bounds = array<i64: 4>, scalar_prefetch = 0 : i64, scratch_operands = 1 : i64, tpu.core_type = #tpu.core_type<tc>, window_params = [{transform_indices = @transform_0, window_bounds = array<i64: 4, 4, 96>}, {pipeline_mode = #tpu.pipeline_mode<synchronous>, transform_indices = @transform_1, window_bounds = array<i64: 4, 96>}, {pipeline_mode = #tpu.pipeline_mode<synchronous>, transform_indices = @transform_2, window_bounds = array<i64: 32, 96>}, {pipeline_mode = #tpu.pipeline_mode<synchronous>, transform_indices = @transform_3, window_bounds = array<i64: 1, 32>}, {pipeline_mode = #tpu.pipeline_mode<synchronous>, transform_indices = @transform_4, window_bounds = array<i64: 1, 32>}, {pipeline_mode = #tpu.pipeline_mode<synchronous>, transform_indices = @transform_5, window_bounds = array<i64: 64, 4>}, {pipeline_mode = #tpu.pipeline_mode<synchronous>, transform_indices = @transform_6, window_bounds = array<i64: 1, 4>}, {pipeline_mode = #tpu.pipeline_mode<synchronous>, transform_indices = @transform_7, window_bounds = array<i64: 2, 4>}, {pipeline_mode = #tpu.pipeline_mode<synchronous>, transform_indices = @transform_8, window_bounds = array<i64: 2, 4>}]} {
    %c0_i32 = arith.constant 0 : i32
    %0 = arith.cmpi eq, %arg0, %c0_i32 : i32
    %1 = arith.extui %0 : i1 to i32
    %c0_i32_0 = arith.constant 0 : i32
    %2 = arith.cmpi ne, %1, %c0_i32_0 : i32
    scf.if %2 {
      %cst_34 = arith.constant 0.000000e+00 : f32
      %138 = vector.broadcast %cst_34 : f32 to vector<4x32xf32>
      %c0_35 = arith.constant 0 : index
      %c0_36 = arith.constant 0 : index
      %139 = vector.load %arg10[%c0_35, %c0_36] : memref<4x32xf32, #tpu.memory_space<vmem>>, vector<4x32xf32>
      tpu.vector_store %arg10[%c0_35, %c0_36], %138 {strides = array<i32>} : memref<4x32xf32, #tpu.memory_space<vmem>>, vector<4x32xf32>,
    } else {
    }
    %c0 = arith.constant 0 : index
    %c0_1 = arith.constant 0 : index
    %3 = vector.load %arg3[%c0, %c0_1] : memref<32x96xf32, #tpu.memory_space<vmem>>, vector<32x96xf32>
    %c0_2 = arith.constant 0 : index
    %c0_3 = arith.constant 0 : index
    %4 = vector.load %arg4[%c0_2, %c0_3] : memref<1x32xf32, #tpu.memory_space<vmem>>, vector<1x32xf32>
    %c0_4 = arith.constant 0 : index
    %c0_5 = arith.constant 0 : index
    %5 = vector.load %arg10[%c0_4, %c0_5] : memref<4x32xf32, #tpu.memory_space<vmem>>, vector<4x32xf32>
    %c0_i32_6 = arith.constant 0 : i32
    %6 = arith.index_cast %c0_i32_6 : i32 to index
    %c0_7 = arith.constant 0 : index
    %c0_8 = arith.constant 0 : index
    %7 = vector.load %arg1[%6, %c0_7, %c0_8] : memref<4x4x96xf32, #tpu.memory_space<vmem>>, vector<1x4x96xf32>
    %8 = vector.shape_cast %7 : vector<1x4x96xf32> to vector<4x96xf32>
    %cst = arith.constant dense<0.000000e+00> : vector<4x96xf32>
    %9 = tpu.matmul %5, %3, %cst {dimension_numbers = #tpu.dot_dimension_numbers<[1], [0], [0], [1], [0, 0, 1, 1], [], []>} : vector<4x32xf32>, vector<32x96xf32>, vector<4x96xf32> -> vector<4x96xf32>
    %10 = vector.extract_strided_slice %8 {offsets = [0, 0], sizes = [4, 32], strides = [1, 1]} : vector<4x96xf32> to vector<4x32xf32>
    %11 = vector.extract_strided_slice %9 {offsets = [0, 0], sizes = [4, 32], strides = [1, 1]} : vector<4x96xf32> to vector<4x32xf32>
    %12 = arith.addf %10, %11 : vector<4x32xf32>
    %13 = arith.negf %12 : vector<4x32xf32>
    %14 = math.exp %13 : vector<4x32xf32>
    %cst_9 = arith.constant 1.000000e+00 : f32
    %15 = vector.broadcast %cst_9 : f32 to vector<4x32xf32>
    %16 = arith.addf %15, %14 : vector<4x32xf32>
    %17 = arith.divf %15, %16 : vector<4x32xf32>
    %18 = vector.extract_strided_slice %8 {offsets = [0, 32], sizes = [4, 32], strides = [1, 1]} : vector<4x96xf32> to vector<4x32xf32>
    %19 = vector.extract_strided_slice %9 {offsets = [0, 32], sizes = [4, 32], strides = [1, 1]} : vector<4x96xf32> to vector<4x32xf32>
    %20 = arith.addf %18, %19 : vector<4x32xf32>
    %21 = arith.negf %20 : vector<4x32xf32>
    %22 = math.exp %21 : vector<4x32xf32>
    %cst_10 = arith.constant 1.000000e+00 : f32
    %23 = vector.broadcast %cst_10 : f32 to vector<4x32xf32>
    %24 = arith.addf %23, %22 : vector<4x32xf32>
    %25 = arith.divf %23, %24 : vector<4x32xf32>
    %26 = vector.extract_strided_slice %8 {offsets = [0, 64], sizes = [4, 32], strides = [1, 1]} : vector<4x96xf32> to vector<4x32xf32>
    %27 = vector.extract_strided_slice %9 {offsets = [0, 64], sizes = [4, 32], strides = [1, 1]} : vector<4x96xf32> to vector<4x32xf32>
    %28 = vector.broadcast %4 : vector<1x32xf32> to vector<4x32xf32>
    %29 = arith.addf %27, %28 : vector<4x32xf32>
    %30 = arith.mulf %17, %29 : vector<4x32xf32>
    %31 = arith.addf %26, %30 : vector<4x32xf32>
    %32 = math.tanh %31 : vector<4x32xf32>
    %cst_11 = arith.constant 1.000000e+00 : f32
    %33 = vector.broadcast %cst_11 : f32 to vector<4x32xf32>
    %34 = arith.subf %33, %25 : vector<4x32xf32>
    %35 = arith.mulf %34, %32 : vector<4x32xf32>
    %36 = arith.mulf %25, %5 : vector<4x32xf32>
    %37 = arith.addf %35, %36 : vector<4x32xf32>
    %c1_i32 = arith.constant 1 : i32
    %38 = arith.index_cast %c1_i32 : i32 to index
    %c0_12 = arith.constant 0 : index
    %c0_13 = arith.constant 0 : index
    %39 = vector.load %arg1[%38, %c0_12, %c0_13] : memref<4x4x96xf32, #tpu.memory_space<vmem>>, vector<1x4x96xf32>
    %40 = vector.shape_cast %39 : vector<1x4x96xf32> to vector<4x96xf32>
    %cst_14 = arith.constant dense<0.000000e+00> : vector<4x96xf32>
    %41 = tpu.matmul %37, %3, %cst_14 {dimension_numbers = #tpu.dot_dimension_numbers<[1], [0], [0], [1], [0, 0, 1, 1], [], []>} : vector<4x32xf32>, vector<32x96xf32>, vector<4x96xf32> -> vector<4x96xf32>
    %42 = vector.extract_strided_slice %40 {offsets = [0, 0], sizes = [4, 32], strides = [1, 1]} : vector<4x96xf32> to vector<4x32xf32>
    %43 = vector.extract_strided_slice %41 {offsets = [0, 0], sizes = [4, 32], strides = [1, 1]} : vector<4x96xf32> to vector<4x32xf32>
    %44 = arith.addf %42, %43 : vector<4x32xf32>
    %45 = arith.negf %44 : vector<4x32xf32>
    %46 = math.exp %45 : vector<4x32xf32>
    %cst_15 = arith.constant 1.000000e+00 : f32
    %47 = vector.broadcast %cst_15 : f32 to vector<4x32xf32>
    %48 = arith.addf %47, %46 : vector<4x32xf32>
    %49 = arith.divf %47, %48 : vector<4x32xf32>
    %50 = vector.extract_strided_slice %40 {offsets = [0, 32], sizes = [4, 32], strides = [1, 1]} : vector<4x96xf32> to vector<4x32xf32>
    %51 = vector.extract_strided_slice %41 {offsets = [0, 32], sizes = [4, 32], strides = [1, 1]} : vector<4x96xf32> to vector<4x32xf32>
    %52 = arith.addf %50, %51 : vector<4x32xf32>
    %53 = arith.negf %52 : vector<4x32xf32>
    %54 = math.exp %53 : vector<4x32xf32>
    %cst_16 = arith.constant 1.000000e+00 : f32
    %55 = vector.broadcast %cst_16 : f32 to vector<4x32xf32>
    %56 = arith.addf %55, %54 : vector<4x32xf32>
    %57 = arith.divf %55, %56 : vector<4x32xf32>
    %58 = vector.extract_strided_slice %40 {offsets = [0, 64], sizes = [4, 32], strides = [1, 1]} : vector<4x96xf32> to vector<4x32xf32>
    %59 = vector.extract_strided_slice %41 {offsets = [0, 64], sizes = [4, 32], strides = [1, 1]} : vector<4x96xf32> to vector<4x32xf32>
    %60 = vector.broadcast %4 : vector<1x32xf32> to vector<4x32xf32>
    %61 = arith.addf %59, %60 : vector<4x32xf32>
    %62 = arith.mulf %49, %61 : vector<4x32xf32>
    %63 = arith.addf %58, %62 : vector<4x32xf32>
    %64 = math.tanh %63 : vector<4x32xf32>
    %cst_17 = arith.constant 1.000000e+00 : f32
    %65 = vector.broadcast %cst_17 : f32 to vector<4x32xf32>
    %66 = arith.subf %65, %57 : vector<4x32xf32>
    %67 = arith.mulf %66, %64 : vector<4x32xf32>
    %68 = arith.mulf %57, %37 : vector<4x32xf32>
    %69 = arith.addf %67, %68 : vector<4x32xf32>
    %c2_i32 = arith.constant 2 : i32
    %70 = arith.index_cast %c2_i32 : i32 to index
    %c0_18 = arith.constant 0 : index
    %c0_19 = arith.constant 0 : index
    %71 = vector.load %arg1[%70, %c0_18, %c0_19] : memref<4x4x96xf32, #tpu.memory_space<vmem>>, vector<1x4x96xf32>
    %72 = vector.shape_cast %71 : vector<1x4x96xf32> to vector<4x96xf32>
    %cst_20 = arith.constant dense<0.000000e+00> : vector<4x96xf32>
    %73 = tpu.matmul %69, %3, %cst_20 {dimension_numbers = #tpu.dot_dimension_numbers<[1], [0], [0], [1], [0, 0, 1, 1], [], []>} : vector<4x32xf32>, vector<32x96xf32>, vector<4x96xf32> -> vector<4x96xf32>
    %74 = vector.extract_strided_slice %72 {offsets = [0, 0], sizes = [4, 32], strides = [1, 1]} : vector<4x96xf32> to vector<4x32xf32>
    %75 = vector.extract_strided_slice %73 {offsets = [0, 0], sizes = [4, 32], strides = [1, 1]} : vector<4x96xf32> to vector<4x32xf32>
    %76 = arith.addf %74, %75 : vector<4x32xf32>
    %77 = arith.negf %76 : vector<4x32xf32>
    %78 = math.exp %77 : vector<4x32xf32>
    %cst_21 = arith.constant 1.000000e+00 : f32
    %79 = vector.broadcast %cst_21 : f32 to vector<4x32xf32>
    %80 = arith.addf %79, %78 : vector<4x32xf32>
    %81 = arith.divf %79, %80 : vector<4x32xf32>
    %82 = vector.extract_strided_slice %72 {offsets = [0, 32], sizes = [4, 32], strides = [1, 1]} : vector<4x96xf32> to vector<4x32xf32>
    %83 = vector.extract_strided_slice %73 {offsets = [0, 32], sizes = [4, 32], strides = [1, 1]} : vector<4x96xf32> to vector<4x32xf32>
    %84 = arith.addf %82, %83 : vector<4x32xf32>
    %85 = arith.negf %84 : vector<4x32xf32>
    %86 = math.exp %85 : vector<4x32xf32>
    %cst_22 = arith.constant 1.000000e+00 : f32
    %87 = vector.broadcast %cst_22 : f32 to vector<4x32xf32>
    %88 = arith.addf %87, %86 : vector<4x32xf32>
    %89 = arith.divf %87, %88 : vector<4x32xf32>
    %90 = vector.extract_strided_slice %72 {offsets = [0, 64], sizes = [4, 32], strides = [1, 1]} : vector<4x96xf32> to vector<4x32xf32>
    %91 = vector.extract_strided_slice %73 {offsets = [0, 64], sizes = [4, 32], strides = [1, 1]} : vector<4x96xf32> to vector<4x32xf32>
    %92 = vector.broadcast %4 : vector<1x32xf32> to vector<4x32xf32>
    %93 = arith.addf %91, %92 : vector<4x32xf32>
    %94 = arith.mulf %81, %93 : vector<4x32xf32>
    %95 = arith.addf %90, %94 : vector<4x32xf32>
    %96 = math.tanh %95 : vector<4x32xf32>
    %cst_23 = arith.constant 1.000000e+00 : f32
    %97 = vector.broadcast %cst_23 : f32 to vector<4x32xf32>
    %98 = arith.subf %97, %89 : vector<4x32xf32>
    %99 = arith.mulf %98, %96 : vector<4x32xf32>
    %100 = arith.mulf %89, %69 : vector<4x32xf32>
    %101 = arith.addf %99, %100 : vector<4x32xf32>
    %c3_i32 = arith.constant 3 : i32
    %102 = arith.index_cast %c3_i32 : i32 to index
    %c0_24 = arith.constant 0 : index
    %c0_25 = arith.constant 0 : index
    %103 = vector.load %arg1[%102, %c0_24, %c0_25] : memref<4x4x96xf32, #tpu.memory_space<vmem>>, vector<1x4x96xf32>
    %104 = vector.shape_cast %103 : vector<1x4x96xf32> to vector<4x96xf32>
    %cst_26 = arith.constant dense<0.000000e+00> : vector<4x96xf32>
    %105 = tpu.matmul %101, %3, %cst_26 {dimension_numbers = #tpu.dot_dimension_numbers<[1], [0], [0], [1], [0, 0, 1, 1], [], []>} : vector<4x32xf32>, vector<32x96xf32>, vector<4x96xf32> -> vector<4x96xf32>
    %106 = vector.extract_strided_slice %104 {offsets = [0, 0], sizes = [4, 32], strides = [1, 1]} : vector<4x96xf32> to vector<4x32xf32>
    %107 = vector.extract_strided_slice %105 {offsets = [0, 0], sizes = [4, 32], strides = [1, 1]} : vector<4x96xf32> to vector<4x32xf32>
    %108 = arith.addf %106, %107 : vector<4x32xf32>
    %109 = arith.negf %108 : vector<4x32xf32>
    %110 = math.exp %109 : vector<4x32xf32>
    %cst_27 = arith.constant 1.000000e+00 : f32
    %111 = vector.broadcast %cst_27 : f32 to vector<4x32xf32>
    %112 = arith.addf %111, %110 : vector<4x32xf32>
    %113 = arith.divf %111, %112 : vector<4x32xf32>
    %114 = vector.extract_strided_slice %104 {offsets = [0, 32], sizes = [4, 32], strides = [1, 1]} : vector<4x96xf32> to vector<4x32xf32>
    %115 = vector.extract_strided_slice %105 {offsets = [0, 32], sizes = [4, 32], strides = [1, 1]} : vector<4x96xf32> to vector<4x32xf32>
    %116 = arith.addf %114, %115 : vector<4x32xf32>
    %117 = arith.negf %116 : vector<4x32xf32>
    %118 = math.exp %117 : vector<4x32xf32>
    %cst_28 = arith.constant 1.000000e+00 : f32
    %119 = vector.broadcast %cst_28 : f32 to vector<4x32xf32>
    %120 = arith.addf %119, %118 : vector<4x32xf32>
    %121 = arith.divf %119, %120 : vector<4x32xf32>
    %122 = vector.extract_strided_slice %104 {offsets = [0, 64], sizes = [4, 32], strides = [1, 1]} : vector<4x96xf32> to vector<4x32xf32>
    %123 = vector.extract_strided_slice %105 {offsets = [0, 64], sizes = [4, 32], strides = [1, 1]} : vector<4x96xf32> to vector<4x32xf32>
    %124 = vector.broadcast %4 : vector<1x32xf32> to vector<4x32xf32>
    %125 = arith.addf %123, %124 : vector<4x32xf32>
    %126 = arith.mulf %113, %125 : vector<4x32xf32>
    %127 = arith.addf %122, %126 : vector<4x32xf32>
    %128 = math.tanh %127 : vector<4x32xf32>
    %cst_29 = arith.constant 1.000000e+00 : f32
    %129 = vector.broadcast %cst_29 : f32 to vector<4x32xf32>
    %130 = arith.subf %129, %121 : vector<4x32xf32>
    %131 = arith.mulf %130, %128 : vector<4x32xf32>
    %132 = arith.mulf %121, %101 : vector<4x32xf32>
    %133 = arith.addf %131, %132 : vector<4x32xf32>
    %c4_i32 = arith.constant 4 : i32
    %c0_30 = arith.constant 0 : index
    %c0_31 = arith.constant 0 : index
    %134 = vector.load %arg10[%c0_30, %c0_31] : memref<4x32xf32, #tpu.memory_space<vmem>>, vector<4x32xf32>
    tpu.vector_store %arg10[%c0_30, %c0_31], %133 {strides = array<i32>} : memref<4x32xf32, #tpu.memory_space<vmem>>, vector<4x32xf32>,
    %c3_i32_32 = arith.constant 3 : i32
    %135 = arith.cmpi eq, %arg0, %c3_i32_32 : i32
    %136 = arith.extui %135 : i1 to i32
    %c0_i32_33 = arith.constant 0 : i32
    %137 = arith.cmpi ne, %136, %c0_i32_33 : i32
    scf.if %137 {
      %c0_34 = arith.constant 0 : index
      %c0_35 = arith.constant 0 : index
      %138 = vector.load %arg2[%c0_34, %c0_35] : memref<4x96xf32, #tpu.memory_space<vmem>>, vector<4x96xf32>
      %c0_36 = arith.constant 0 : index
      %c0_37 = arith.constant 0 : index
      %139 = vector.load %arg5[%c0_36, %c0_37] : memref<1x32xf32, #tpu.memory_space<vmem>>, vector<1x32xf32>
      %140 = vector.extract_strided_slice %138 {offsets = [0, 0], sizes = [4, 32], strides = [1, 1]} : vector<4x96xf32> to vector<4x32xf32>
      %141 = arith.negf %140 : vector<4x32xf32>
      %142 = math.exp %141 : vector<4x32xf32>
      %cst_38 = arith.constant 1.000000e+00 : f32
      %143 = vector.broadcast %cst_38 : f32 to vector<4x32xf32>
      %144 = arith.addf %143, %142 : vector<4x32xf32>
      %145 = arith.divf %143, %144 : vector<4x32xf32>
      %146 = vector.extract_strided_slice %138 {offsets = [0, 32], sizes = [4, 32], strides = [1, 1]} : vector<4x96xf32> to vector<4x32xf32>
      %147 = arith.negf %146 : vector<4x32xf32>
      %148 = math.exp %147 : vector<4x32xf32>
      %cst_39 = arith.constant 1.000000e+00 : f32
      %149 = vector.broadcast %cst_39 : f32 to vector<4x32xf32>
      %150 = arith.addf %149, %148 : vector<4x32xf32>
      %151 = arith.divf %149, %150 : vector<4x32xf32>
      %152 = vector.extract_strided_slice %138 {offsets = [0, 64], sizes = [4, 32], strides = [1, 1]} : vector<4x96xf32> to vector<4x32xf32>
      %153 = vector.broadcast %139 : vector<1x32xf32> to vector<4x32xf32>
      %154 = arith.mulf %145, %153 : vector<4x32xf32>
      %155 = arith.addf %152, %154 : vector<4x32xf32>
      %156 = math.tanh %155 : vector<4x32xf32>
      %cst_40 = arith.constant 1.000000e+00 : f32
      %157 = vector.broadcast %cst_40 : f32 to vector<4x32xf32>
      %158 = arith.subf %157, %151 : vector<4x32xf32>
      %159 = arith.mulf %158, %156 : vector<4x32xf32>
      %160 = vector.extract_strided_slice %133 {offsets = [0, 0], sizes = [2, 32], strides = [1, 1]} : vector<4x32xf32> to vector<2x32xf32>
      %161 = vector.extract_strided_slice %133 {offsets = [2, 0], sizes = [2, 32], strides = [1, 1]} : vector<4x32xf32> to vector<2x32xf32>
      %162 = arith.mulf %160, %161 : vector<2x32xf32>
      %163 = vector.extract_strided_slice %159 {offsets = [0, 0], sizes = [2, 32], strides = [1, 1]} : vector<4x32xf32> to vector<2x32xf32>
      %164 = vector.extract_strided_slice %159 {offsets = [2, 0], sizes = [2, 32], strides = [1, 1]} : vector<4x32xf32> to vector<2x32xf32>
      %165 = arith.mulf %163, %164 : vector<2x32xf32>
      %c0_41 = arith.constant 0 : index
      %c0_42 = arith.constant 0 : index
      %166 = vector.load %arg6[%c0_41, %c0_42] : memref<64x4xf32, #tpu.memory_space<vmem>>, vector<64x4xf32>
      %167 = vector.extract_strided_slice %166 {offsets = [0, 0], sizes = [32, 4], strides = [1, 1]} : vector<64x4xf32> to vector<32x4xf32>
      %cst_43 = arith.constant dense<0.000000e+00> : vector<2x4xf32>
      %168 = tpu.matmul %162, %167, %cst_43 {dimension_numbers = #tpu.dot_dimension_numbers<[1], [0], [0], [1], [0, 0, 1, 1], [], []>} : vector<2x32xf32>, vector<32x4xf32>, vector<2x4xf32> -> vector<2x4xf32>
      %169 = vector.extract_strided_slice %166 {offsets = [32, 0], sizes = [32, 4], strides = [1, 1]} : vector<64x4xf32> to vector<32x4xf32>
      %cst_44 = arith.constant dense<0.000000e+00> : vector<2x4xf32>
      %170 = tpu.matmul %165, %169, %cst_44 {dimension_numbers = #tpu.dot_dimension_numbers<[1], [0], [0], [1], [0, 0, 1, 1], [], []>} : vector<2x32xf32>, vector<32x4xf32>, vector<2x4xf32> -> vector<2x4xf32>
      %171 = arith.addf %168, %170 : vector<2x4xf32>
      %c0_45 = arith.constant 0 : index
      %c0_46 = arith.constant 0 : index
      %172 = vector.load %arg7[%c0_45, %c0_46] : memref<1x4xf32, #tpu.memory_space<vmem>>, vector<1x4xf32>
      %173 = vector.broadcast %172 : vector<1x4xf32> to vector<2x4xf32>
      %174 = arith.addf %171, %173 : vector<2x4xf32>
      %c0_47 = arith.constant 0 : index
      %c0_48 = arith.constant 0 : index
      %175 = vector.load %arg8[%c0_47, %c0_48] : memref<2x4xf32, #tpu.memory_space<vmem>>, vector<2x4xf32>
      tpu.vector_store %arg8[%c0_47, %c0_48], %174 {strides = array<i32>} : memref<2x4xf32, #tpu.memory_space<vmem>>, vector<2x4xf32>,
      %cst_49 = arith.constant dense<0xFF800000> : vector<2xf32>
      %176 = vector.multi_reduction <maximumf>, %174, %cst_49 [1] : vector<2x4xf32> to vector<2xf32>
      %177 = vector.shape_cast %176 : vector<2xf32> to vector<2x1xf32>
      %178 = vector.broadcast %177 : vector<2x1xf32> to vector<2x4xf32>
      %179 = arith.subf %174, %178 : vector<2x4xf32>
      %180 = math.exp %179 : vector<2x4xf32>
      %cst_50 = arith.constant dense<0.000000e+00> : vector<2xf32>
      %181 = vector.multi_reduction <add>, %180, %cst_50 [1] : vector<2x4xf32> to vector<2xf32>
      %182 = vector.shape_cast %181 : vector<2xf32> to vector<2x1xf32>
      %183 = vector.broadcast %182 : vector<2x1xf32> to vector<2x4xf32>
      %184 = arith.divf %180, %183 : vector<2x4xf32>
      %c0_51 = arith.constant 0 : index
      %c0_52 = arith.constant 0 : index
      %185 = vector.load %arg9[%c0_51, %c0_52] : memref<2x4xf32, #tpu.memory_space<vmem>>, vector<2x4xf32>
      tpu.vector_store %arg9[%c0_51, %c0_52], %184 {strides = array<i32>} : memref<2x4xf32, #tpu.memory_space<vmem>>, vector<2x4xf32>,
    } else {
    }
    return
  }
  func.func @transform_0(%arg0: i32) -> (i32, i32, i32) {
    %c0_i32 = arith.constant 0 : i32
    %c0_i32_0 = arith.constant 0 : i32
    %c0_i32_1 = arith.constant 0 : i32
    return %arg0, %c0_i32, %c0_i32_0 : i32, i32, i32
  }
  func.func @transform_1(%arg0: i32) -> (i32, i32) {
    %c0_i32 = arith.constant 0 : i32
    %c0_i32_0 = arith.constant 0 : i32
    %c0_i32_1 = arith.constant 0 : i32
    return %c0_i32, %c0_i32_0 : i32, i32
  }
  func.func @transform_2(%arg0: i32) -> (i32, i32) {
    %c0_i32 = arith.constant 0 : i32
    %c0_i32_0 = arith.constant 0 : i32
    %c0_i32_1 = arith.constant 0 : i32
    return %c0_i32, %c0_i32_0 : i32, i32
  }
  func.func @transform_3(%arg0: i32) -> (i32, i32) {
    %c0_i32 = arith.constant 0 : i32
    %c0_i32_0 = arith.constant 0 : i32
    %c0_i32_1 = arith.constant 0 : i32
    return %c0_i32, %c0_i32_0 : i32, i32
  }
  func.func @transform_4(%arg0: i32) -> (i32, i32) {
    %c0_i32 = arith.constant 0 : i32
    %c0_i32_0 = arith.constant 0 : i32
    %c0_i32_1 = arith.constant 0 : i32
    return %c0_i32, %c0_i32_0 : i32, i32
  }
  func.func @transform_5(%arg0: i32) -> (i32, i32) {
    %c0_i32 = arith.constant 0 : i32
    %c0_i32_0 = arith.constant 0 : i32
    %c0_i32_1 = arith.constant 0 : i32
    return %c0_i32, %c0_i32_0 : i32, i32
  }
  func.func @transform_6(%arg0: i32) -> (i32, i32) {
    %c0_i32 = arith.constant 0 : i32
    %c0_i32_0 = arith.constant 0 : i32
    %c0_i32_1 = arith.constant 0 : i32
    return %c0_i32, %c0_i32_0 : i32, i32
  }
  func.func @transform_7(%arg0: i32) -> (i32, i32) {
    %c0_i32 = arith.constant 0 : i32
    %c0_i32_0 = arith.constant 0 : i32
    %c0_i32_1 = arith.constant 0 : i32
    return %c0_i32, %c0_i32_0 : i32, i32
  }
  func.func @transform_8(%arg0: i32) -> (i32, i32) {
    %c0_i32 = arith.constant 0 : i32
    %c0_i32_0 = arith.constant 0 : i32
    %c0_i32_1 = arith.constant 0 : i32
    return %c0_i32, %c0_i32_0 : i32, i32
  }
}

</mosaic_0001>

<bundles_post_ra>
// kernel: bigru_forward.2
= control target key start
LH: loop header
LB: loop body
LE: loop exit
PB: predicated region body
PF: predicated region fallthrough
CT: control target
= control target key end

     0   :  { %s1610_s18 = smov 0   ;;  %s1823_s0 = inlined_call_operand.vmem [shape: f32[16,4,96], index: 0, kind: input, shape index: {}]   ;;  %s1824_s1 = inlined_call_operand.vmem [shape: f32[16,4,96], index: 1, kind: input, shape index: {}]   ;;  %s1825_s2 = inlined_call_operand.vmem [shape: f32[2,32,96], index: 2, kind: input, shape index: {}]   ;;  %s1826_s3 = inlined_call_operand.vmem [shape: f32[2,1,32], index: 3, kind: input, shape index: {}]   ;;  %s1827_s4 = inlined_call_operand.vmem [shape: f32[16,4,32], index: 4, kind: output, shape index: {0}]   ;;  %s1828_s5 = inlined_call_operand.vmem [shape: f32[16,4,32], index: 5, kind: output, shape index: {1}]  }
   0x1 LB: > { %s1275_s19 = sadd.s32 4294967295, %s1571_s18   ;;  %p1279_p0 = scmp.ge.s32.totalorder %s1571_s18, 1  ;;  %s1571_s18 = sphi %s1610_s18, %s16_s18  }
   0x2   : > { %p204_p1 = scmp.lt.s32.totalorder %s1571_s18, 5 }
   0x4   : > { %p205_p2 = pnand %p1279_p0, %p204_p1 }
   0x5   : > { %s1280_s20 = sshll.u32 (!%p205_p2), %s1275_s19, 2  ;;  %s261_s21 = ssub.s32 (!%p205_p2), 3, %s1275_s19 }
   0x6   : > { %208 = sbr.rel (%p205_p2) target bundleno = 2811 (0xafb), region = 36  ;;  %p244_p3 = scmp.lt.s32.totalorder (!%p205_p2), %s1280_s20, 15 }
   0x7   : > { %s1286_s22 = sshll.u32 (!%p205_p2), %s261_s21, 2  ;;  %p1288_p5 = scmp.ne.s32.totalorder (!%p205_p2), %s1275_s19, 0 }
   0x8   : > { %p263_p4 = scmp.lt.s32.totalorder (!%p205_p2), %s1286_s22, 15 }
   0xd   : > { %s1830_s20 = smov (!%p244_p3, %s1280_s20), 15  ;;  %s1832_s22 = smov (!%p263_p4, %s1286_s22), 15 }
   0xe   : > { %s1281_s23 = sshll.u32 %s1830_s20, 2  ;;  %s1287_s8 = sshll.u32 %s1832_s22, 2  ;;  %vm273_vm0 = vcmask (!%p1288_p5), 257024   ;;  %v1573_v0 = vmov (!%p1288_p5), 0.0  }
   0xf   : > { %s1621_s26 = scalar_lea.vmem %s1823_s0, %s1281_s23  ;;  %s1626_s29 = scalar_lea.vmem %s1824_s1, %s1281_s23  ;;  %274 = vst.msk [vmem:[#allocation2] sm:$0xf] (!%p1288_p5), %vm273_vm0, %v1573_v0  ;;  %275 = vst.msk [vmem:[#allocation3] sm:$0xf] (!%p1288_p5), %vm273_vm0, %v1573_v0 }
  0x10   : > { %s1631_s7 = scalar_lea.vmem %s1827_s4, %s1281_s23  ;;  %s1636_s11 = scalar_lea.vmem %s1828_s5, %s1287_s8 }
  0x11   : > { %272 = sbr.rel (%p1288_p5) target bundleno = 24 (0x18), region = 40 }
  0x18 PF: > { %v276_v1 = vld [vmem:[%s1825_s2] sm:$0xff]  ;;  %v277_v2 = vld [vmem:[%s1825_s2 + $0x8] sm:$0xff]  ;;  %v1574_v4 = vmov 0.0|0.0   ;;  %v278_v7 = vld [vmem:[%s1825_s2 + $0x10] sm:$0xff]  ;;  %vm1575_vm1 = vmmov 0   ;;  %v1576_v10 = vmov 0.0  }
  0x19   : > { %v1289_v3 = vld [vmem:[%s1825_s2 + $0x20] sm:$0xff]  ;;  %1454 = vmatprep.subr.bf16.mxu0 %v1574_v4  ;;  %v1648_v5 = vpack.c.bf16 %v277_v2, %v276_v1  ;;  %1460 = vmatprep.subr.bf16.mxu1 %v1574_v4  ;;  %v1290_v6 = vld [vmem:[%s1825_s2 + $0x28] sm:$0xff]  ;;  %v279_v8 = vld [vmem:[%s1825_s2 + $0x18] sm:$0xff]  ;;  %s1577_s9 = smov 64   ;;  %vm291_vm2 = vcmask 261120   ;;  %s1578_s13 = smov 32  }
  0x1a   : > { %v1660_v9 = vpack.c.bf16 %v1290_v6, %v1289_v3  ;;  %1374 = vmatprep.mubr.msk.f32.mxu0 %vm1575_vm1, %v1576_v10  ;;  %v1291_v11 = vld [vmem:[%s1825_s2 + $0x30] sm:$0xff]  ;;  %v1292_v12 = vld [vmem:[%s1825_s2 + $0x38] sm:$0xff]  ;;  %1385 = vmatprep.mubr.msk.f32.mxu1 %vm1575_vm1, %v1576_v10  ;;  %v1673_v13 = vpack.c.bf16 %v279_v8, %v278_v7  ;;  %v1296_v14 = vld [vmem:[%s1826_s3] ss:$0 sm:$0xff]  ;;  %s1579_s14 = smov 96   ;;  %vm519_vm3 = vcmask 257024  }
  0x1b   : > { %1456 = vmatpush3.bf16.msra.mxu0 %v1648_v5  ;;  %v1680_v15 = vpack.c.bf16 %v1292_v12, %v1291_v11  ;;  %377 = vrot.lane.b32.xlu0 %v1296_v14, %s1577_s9  ;;  %v1299_v16 = vld [vmem:[%s1826_s3 + $0x1] ss:$0 sm:$0xff]  ;;  %v288_v17 = vld [vmem:[#allocation2] sm:$0xf]  ;;  %v289_v18 = vld [vmem:[#allocation3] sm:$0xf] }
  0x1c   : > { %1457 = vmatprep.subr.bf16.mxu0 %v1574_v4  ;;  %1462 = vmatpush3.bf16.msra.mxu1 %v1660_v9  ;;  %v290_v27 = vld [vmem:[%s1621_s26] sm:$0xf]  ;;  %v1301_v7 = vld [vmem:[%s1621_s26 + $0x4] sm:$0xf] }
  0x1d   : > { %1463 = vmatprep.subr.bf16.mxu1 %v1574_v4  ;;  %v403_v29 = vld [vmem:[%s1626_s29] sm:$0xf]  ;;  %v1304_v11 = vld [vmem:[%s1626_s29 + $0x4] sm:$0xf] }
  0x1f   : > { %1459 = vmatpush3.bf16.msra.mxu0 %v1673_v13  ;;  %489 = vrot.lane.b32.xlu0 %v1299_v16, %s1577_s9 }
  0x20   : > { %1465 = vmatpush3.bf16.msra.mxu1 %v1680_v15  ;;  %1466 = vmatprep.subr.bf16.mxu0 %v1574_v4 }
  0x21   : > { %1472 = vmatprep.subr.bf16.mxu1 %v1574_v4 }
  0x22   : > { %1375 = vmatmul.mubr.msk.f32.vlgmr.msra.gmra.mrb[0].mxu0 %vm291_vm2, %v288_v17 }
  0x23   : > { %1386 = vmatmul.mubr.msk.f32.vlgmr.msra.gmra.mrb[0].mxu1 %vm291_vm2, %v289_v18  ;;  %1468 = vmatpush3.bf16.msra.mxu0 %v1648_v5 }
  0x24   : > { %1469 = vmatprep.subr.bf16.mxu0 %v1574_v4  ;;  %1474 = vmatpush3.bf16.msra.mxu1 %v1660_v9 }
  0x25   : > { %1396 = vmatprep.mubr.msk.f32.mxu0 %vm1575_vm1, %v1576_v10  ;;  %1475 = vmatprep.subr.bf16.mxu1 %v1574_v4 }
  0x26   : > { %1407 = vmatprep.mubr.msk.f32.mxu1 %vm1575_vm1, %v1576_v10 }
  0x27   : > { %1471 = vmatpush3.bf16.msra.mxu0 %v1673_v13 }
  0x28   : > { %1477 = vmatpush3.bf16.msra.mxu1 %v1680_v15  ;;  %1478 = vmatprep.subr.bf16.mxu0 %v1574_v4 }
  0x29   : > { %1484 = vmatprep.subr.bf16.mxu1 %v1574_v4 }
  0x8d   : > { %v1706_v19 = vpop.permute.xlu0 %377 }
  0x91   : > { %v1708_v21 = vpop.permute.xlu0 %489 }
  0xf5   : > { %v361_v20 = vpop.f32.mrb[0].mxu0 }
  0xf6   : > { %v1376_v22 = vpop.f32.mrb[1].mxu0  ;;  %v473_v23 = vpop.f32.mrb[0].mxu1  ;;  %v380_v24 = vadd.f32 %v1706_v19, %v361_v20  ;;  %v365_v28 = vadd.f32 %v361_v20, %v290_v27 }
  0xf7   : > { %v1387_v25 = vpop.f32.mrb[1].mxu1  ;;  %v492_v26 = vadd.f32 %v1708_v21, %v473_v23  ;;  %v477_v31 = vadd.f32 %v473_v23, %v403_v29 }
  0xf8   : > { %382 = vrot.lane.b32.xlu1 %v380_v24, %s1577_s9  ;;  %v1295_v30 = vmul.f32 -1.442695, %v365_v28 }
  0xf9   : > { %v1298_v32 = vmul.f32 -1.442695, %v477_v31 }
  0xfa   : > { %1517 = vpow2.f32 %v1295_v30 }
  0xfb   : > { %1519 = vpow2.f32 %v1298_v32 }
  0xfc   : > { %494 = vrot.lane.b32.xlu1 %v492_v26, %s1577_s9 }
 0x104   : > { %v1518_v33 = vpop.eup %1517 }
 0x105   : > { %v369_v34 = vadd.f32 1.0, %v1518_v33  ;;  %v1520_v35 = vpop.eup %1519 }
 0x106   : > { %v481_v36 = vadd.f32 1.0, %v1520_v35 }
 0x107   : > { %1521 = vrcp.f32 %v369_v34 }
 0x108   : > { %1523 = vrcp.f32 %v481_v36 }
 0x111   : > { %v1522_v37 = vpop.eup %1521 }
 0x112   : > { %v1524_v40 = vpop.eup %1523  ;;  %v392_v50 = vsub.f32 1.0, %v1522_v37 }
 0x113   : > { %v504_v56 = vsub.f32 1.0, %v1524_v40 }
 0x16a   : > { %v383_v38 = vpop.permute.xlu1 %382 }
 0x16b   : > { %v385_v39 = vmul.f32 %v1522_v37, %v383_v38 }
 0x16d   : > { %387 = vrot.lane.b32.xlu0 %v385_v39, %s1577_s9 }
 0x16e   : > { %v495_v41 = vpop.permute.xlu1 %494 }
 0x16f   : > { %v497_v42 = vmul.f32 %v1524_v40, %v495_v41 }
 0x171   : > { %499 = vrot.lane.b32.xlu1 %v497_v42, %s1577_s9 }
 0x175   : > { %398 = vrot.lane.b32.xlu1 %v288_v17, %s1578_s13 }
 0x179   : > { %510 = vrot.lane.b32.xlu1 %v289_v18, %s1578_s13 }
 0x1df   : > { %v388_v43 = vpop.permute.xlu0 %387 }
 0x1e0   : > { %v390_v44 = vadd.f32 %v388_v43, %v290_v27 }
 0x1e2   : > { %1525 = vtanh.f32 %v390_v44 }
 0x1e3   : > { %v500_v45 = vpop.permute.xlu1 %499 }
 0x1e4   : > { %v502_v46 = vadd.f32 %v500_v45, %v403_v29 }
 0x1e6   : > { %1527 = vtanh.f32 %v502_v46 }
 0x1e7   : > { %v399_v49 = vpop.permute.xlu1 %398 }
 0x1e8   : > { %v401_v52 = vmul.f32 %v1522_v37, %v399_v49 }
 0x1eb   : > { %v511_v54 = vpop.permute.xlu1 %510 }
 0x1ec   : > { %v1526_v47 = vpop.eup %1525  ;;  %v513_v58 = vmul.f32 %v1524_v40, %v511_v54 }
 0x1ed   : > { %394 = vrot.lane.b32.xlu0 %v1526_v47, %s1579_s14 }
 0x1f0   : > { %v1528_v48 = vpop.eup %1527 }
 0x1f1   : > { %506 = vrot.lane.b32.xlu0 %v1528_v48, %s1579_s14 }
 0x25f   : > { %v395_v51 = vpop.permute.xlu0 %394 }
 0x260   : > { %v397_v53 = vmul.f32 %v395_v51, %v392_v50 }
 0x262   : > { %v1720_v55 = vadd.f32 %v401_v52, %v397_v53 }
 0x263   : > { %v507_v57 = vpop.permute.xlu0 %506 }
 0x264   : > { %v509_v59 = vmul.f32 %v507_v57, %v504_v56  ;;  %516 = vrot.lane.b32.xlu0 %v1720_v55, %s1579_s14 }
 0x266   : > { %v1724_v60 = vadd.f32 %v513_v58, %v509_v59 }
 0x268   : > { %522 = vrot.lane.b32.xlu1 %v1724_v60, %s1579_s14 }
 0x2d6   : > { %v517_v61 = vpop.permute.xlu0 %516 }
 0x2d7   : > { %520 = vst.msk [vmem:[%s1631_s7] sm:$0xf] %vm519_vm3, %v517_v61  ;;  %1397 = vmatmul.mubr.msk.f32.vlgmr.msra.gmra.mrb[2].mxu0 %vm291_vm2, %v517_v61 }
 0x2d8   : > { %1480 = vmatpush3.bf16.msra.mxu0 %v1648_v5  ;;  %1418 = vmatprep.mubr.msk.f32.mxu0 %vm1575_vm1, %v1576_v10 }
 0x2d9   : > { %1481 = vmatprep.subr.bf16.mxu0 %v1574_v4 }
 0x2da   : > { %v523_v62 = vpop.permute.xlu1 %522 }
 0x2db   : > { %1300 = vst.msk [vmem:[%s1636_s11 + $0xc] sm:$0xf] %vm519_vm3, %v523_v62  ;;  %1408 = vmatmul.mubr.msk.f32.vlgmr.msra.gmra.mrb[2].mxu1 %vm291_vm2, %v523_v62 }
 0x2dc   : > { %1483 = vmatpush3.bf16.msra.mxu0 %v1673_v13  ;;  %1486 = vmatpush3.bf16.msra.mxu1 %v1660_v9 }
 0x2dd   : > { %1487 = vmatprep.subr.bf16.mxu1 %v1574_v4  ;;  %1429 = vmatprep.mubr.msk.f32.mxu1 %vm1575_vm1, %v1576_v10 }
 0x2de   : > { %1490 = vmatprep.subr.bf16.mxu0 %v1574_v4 }
 0x2e0   : > { %1489 = vmatpush3.bf16.msra.mxu1 %v1680_v15 }
 0x2e1   : > { %1496 = vmatprep.subr.bf16.mxu1 %v1574_v4 }
 0x3aa   : > { %v597_v63 = vpop.f32.mrb[2].mxu0 }
 0x3ab   : > { %v608_v0 = vadd.f32 %v597_v63, %v1706_v19  ;;  %v1398_v1 = vpop.f32.mrb[3].mxu0  ;;  %v601_v8 = vadd.f32 %v1301_v7, %v597_v63 }
 0x3ad   : > { %610 = vrot.lane.b32.xlu0 %v608_v0, %s1577_s9  ;;  %v1303_v12 = vmul.f32 -1.442695, %v601_v8 }
 0x3ae   : > { %v698_v2 = vpop.f32.mrb[2].mxu1 }
 0x3af   : > { %v709_v3 = vadd.f32 %v698_v2, %v1708_v21  ;;  %v1409_v6 = vpop.f32.mrb[3].mxu1  ;;  %v702_v14 = vadd.f32 %v1304_v11, %v698_v2  ;;  %1529 = vpow2.f32 %v1303_v12 }
 0x3b1   : > { %711 = vrot.lane.b32.xlu1 %v709_v3, %s1577_s9  ;;  %v1306_v16 = vmul.f32 -1.442695, %v702_v14 }
 0x3b3   : > { %1531 = vpow2.f32 %v1306_v16 }
 0x3b9   : > { %v1530_v17 = vpop.eup %1529 }
 0x3ba   : > { %v605_v18 = vadd.f32 1.0, %v1530_v17 }
 0x3bc   : > { %1533 = vrcp.f32 %v605_v18 }
 0x3bd   : > { %v1532_v20 = vpop.eup %1531 }
 0x3be   : > { %v706_v22 = vadd.f32 1.0, %v1532_v20 }
 0x3c0   : > { %1535 = vrcp.f32 %v706_v22 }
 0x3c6   : > { %v1534_v23 = vpop.eup %1533 }
 0x3c7   : > { %v620_v35 = vsub.f32 1.0, %v1534_v23  ;;  %v626_v37 = vmul.f32 %v1534_v23, %v1720_v55 }
 0x3ca   : > { %v1536_v26 = vpop.eup %1535 }
 0x3cb   : > { %v721_v40 = vsub.f32 1.0, %v1536_v26  ;;  %v727_v42 = vmul.f32 %v1536_v26, %v1724_v60 }
 0x41f   : > { %v611_v24 = vpop.permute.xlu0 %610 }
 0x420   : > { %v613_v25 = vmul.f32 %v1534_v23, %v611_v24 }
 0x422   : > { %615 = vrot.lane.b32.xlu0 %v613_v25, %s1577_s9 }
 0x423   : > { %v712_v27 = vpop.permute.xlu1 %711 }
 0x424   : > { %v714_v28 = vmul.f32 %v1536_v26, %v712_v27 }
 0x426   : > { %716 = vrot.lane.b32.xlu1 %v714_v28, %s1577_s9 }
 0x494   : > { %v616_v29 = vpop.permute.xlu0 %615 }
 0x495   : > { %v618_v30 = vadd.f32 %v1301_v7, %v616_v29 }
 0x497   : > { %1537 = vtanh.f32 %v618_v30 }
 0x498   : > { %v717_v31 = vpop.permute.xlu1 %716 }
 0x499   : > { %v719_v32 = vadd.f32 %v1304_v11, %v717_v31  ;;  %v1317_v31 = vld [vmem:[%s1621_s26 + $0xc] sm:$0xf] }
 0x49b   : > { %1539 = vtanh.f32 %v719_v32 }
 0x4a1   : > { %v1538_v33 = vpop.eup %1537 }
 0x4a2   : > { %622 = vrot.lane.b32.xlu0 %v1538_v33, %s1579_s14  ;;  %v1320_v33 = vld [vmem:[%s1626_s29 + $0xc] sm:$0xf] }
 0x4a5   : > { %v1540_v34 = vpop.eup %1539 }
 0x4a6   : > { %723 = vrot.lane.b32.xlu1 %v1540_v34, %s1579_s14 }
 0x514   : > { %v623_v36 = vpop.permute.xlu0 %622 }
 0x515   : > { %v625_v38 = vmul.f32 %v623_v36, %v620_v35 }
 0x517   : > { %v1757_v39 = vadd.f32 %v626_v37, %v625_v38 }
 0x518   : > { %v724_v41 = vpop.permute.xlu1 %723 }
 0x519   : > { %v726_v43 = vmul.f32 %v724_v41, %v721_v40  ;;  %730 = vrot.lane.b32.xlu0 %v1757_v39, %s1579_s14 }
 0x51b   : > { %v1762_v44 = vadd.f32 %v727_v42, %v726_v43 }
 0x51d   : > { %736 = vrot.lane.b32.xlu1 %v1762_v44, %s1579_s14 }
 0x58b   : > { %v731_v45 = vpop.permute.xlu0 %730 }
 0x58c   : > { %1307 = vst.msk [vmem:[%s1631_s7 + $0x4] sm:$0xf] %vm519_vm3, %v731_v45  ;;  %1419 = vmatmul.mubr.msk.f32.vlgmr.msra.gmra.mrb[4].mxu0 %vm291_vm2, %v731_v45 }
 0x58d   : > { %1492 = vmatpush3.bf16.msra.mxu0 %v1648_v5  ;;  %1440 = vmatprep.mubr.msk.f32.mxu0 %vm1575_vm1, %v1576_v10 }
 0x58e   : > { %1493 = vmatprep.subr.bf16.mxu0 %v1574_v4 }
 0x58f   : > { %v737_v46 = vpop.permute.xlu1 %736 }
 0x590   : > { %1308 = vst.msk [vmem:[%s1636_s11 + $0x8] sm:$0xf] %vm519_vm3, %v737_v46  ;;  %1430 = vmatmul.mubr.msk.f32.vlgmr.msra.gmra.mrb[4].mxu1 %vm291_vm2, %v737_v46 }
 0x591   : > { %1495 = vmatpush3.bf16.msra.mxu0 %v1673_v13  ;;  %1498 = vmatpush3.bf16.msra.mxu1 %v1660_v9  ;;  %v1309_v9 = vld [vmem:[%s1621_s26 + $0x8] sm:$0xf] }
 0x592   : > { %1499 = vmatprep.subr.bf16.mxu1 %v1574_v4  ;;  %1451 = vmatprep.mubr.msk.f32.mxu1 %vm1575_vm1, %v1576_v10  ;;  %v1312_v4 = vld [vmem:[%s1626_s29 + $0x8] sm:$0xf] }
 0x595   : > { %1501 = vmatpush3.bf16.msra.mxu1 %v1680_v15 }
 0x65f   : > { %v811_v5 = vpop.f32.mrb[4].mxu0 }
 0x660   : > { %v822_v47 = vadd.f32 %v811_v5, %v1706_v19  ;;  %v1420_v48 = vpop.f32.mrb[5].mxu0  ;;  %v815_v13 = vadd.f32 %v1309_v9, %v811_v5 }
 0x662   : > { %824 = vrot.lane.b32.xlu0 %v822_v47, %s1577_s9  ;;  %v1311_v52 = vmul.f32 -1.442695, %v815_v13 }
 0x663   : > { %v912_v49 = vpop.f32.mrb[4].mxu1 }
 0x664   : > { %v923_v50 = vadd.f32 %v912_v49, %v1708_v21  ;;  %v1431_v51 = vpop.f32.mrb[5].mxu1  ;;  %v916_v53 = vadd.f32 %v1312_v4, %v912_v49  ;;  %1541 = vpow2.f32 %v1311_v52 }
 0x666   : > { %925 = vrot.lane.b32.xlu1 %v923_v50, %s1577_s9  ;;  %v1314_v10 = vmul.f32 -1.442695, %v916_v53 }
 0x668   : > { %1543 = vpow2.f32 %v1314_v10 }
 0x66e   : > { %v1542_v15 = vpop.eup %1541 }
 0x66f   : > { %v819_v54 = vadd.f32 1.0, %v1542_v15 }
 0x671   : > { %1545 = vrcp.f32 %v819_v54 }
 0x672   : > { %v1544_v55 = vpop.eup %1543 }
 0x673   : > { %v920_v56 = vadd.f32 1.0, %v1544_v55 }
 0x675   : > { %1547 = vrcp.f32 %v920_v56 }
 0x67b   : > { %v1546_v57 = vpop.eup %1545 }
 0x67c   : > { %v834_v7 = vsub.f32 1.0, %v1546_v57  ;;  %v840_v11 = vmul.f32 %v1546_v57, %v1757_v39 }
 0x67f   : > { %v1548_v60 = vpop.eup %1547 }
 0x680   : > { %v935_v16 = vsub.f32 1.0, %v1548_v60  ;;  %v941_v18 = vmul.f32 %v1548_v60, %v1762_v44 }
 0x6d4   : > { %v825_v58 = vpop.permute.xlu0 %824 }
 0x6d5   : > { %v827_v59 = vmul.f32 %v1546_v57, %v825_v58 }
 0x6d7   : > { %829 = vrot.lane.b32.xlu0 %v827_v59, %s1577_s9 }
 0x6d8   : > { %v926_v61 = vpop.permute.xlu1 %925 }
 0x6d9   : > { %v928_v62 = vmul.f32 %v1548_v60, %v926_v61 }
 0x6db   : > { %930 = vrot.lane.b32.xlu1 %v928_v62, %s1577_s9 }
 0x749   : > { %v830_v63 = vpop.permute.xlu0 %829 }
 0x74a   : > { %v832_v0 = vadd.f32 %v1309_v9, %v830_v63 }
 0x74c   : > { %1549 = vtanh.f32 %v832_v0 }
 0x74d   : > { %v931_v1 = vpop.permute.xlu1 %930 }
 0x74e   : > { %v933_v2 = vadd.f32 %v1312_v4, %v931_v1 }
 0x750   : > { %1551 = vtanh.f32 %v933_v2 }
 0x756   : > { %v1550_v3 = vpop.eup %1549 }
 0x757   : > { %836 = vrot.lane.b32.xlu0 %v1550_v3, %s1579_s14 }
 0x75a   : > { %v1552_v6 = vpop.eup %1551 }
 0x75b   : > { %937 = vrot.lane.b32.xlu1 %v1552_v6, %s1579_s14 }
 0x7c9   : > { %v837_v8 = vpop.permute.xlu0 %836 }
 0x7ca   : > { %v839_v12 = vmul.f32 %v837_v8, %v834_v7 }
 0x7cc   : > { %v841_v14 = vadd.f32 %v840_v11, %v839_v12 }
 0x7cd   : > { %v938_v17 = vpop.permute.xlu1 %937 }
 0x7ce   : > { %v940_v20 = vmul.f32 %v938_v17, %v935_v16  ;;  %944 = vrot.lane.b32.xlu0 %v841_v14, %s1579_s14 }
 0x7d0   : > { %v942_v22 = vadd.f32 %v941_v18, %v940_v20 }
 0x7d2   : > { %950 = vrot.lane.b32.xlu1 %v942_v22, %s1579_s14 }
 0x840   : > { %v945_v23 = vpop.permute.xlu0 %944 }
 0x841   : > { %1315 = vst.msk [vmem:[%s1631_s7 + $0x8] sm:$0xf] %vm519_vm3, %v945_v23  ;;  %1441 = vmatmul.mubr.msk.f32.vlgmr.msra.gmra.mrb[6].mxu0 %vm291_vm2, %v945_v23 }
 0x844   : > { %v951_v24 = vpop.permute.xlu1 %950 }
 0x845   : > { %1316 = vst.msk [vmem:[%s1636_s11 + $0x4] sm:$0xf] %vm519_vm3, %v951_v24  ;;  %1452 = vmatmul.mubr.msk.f32.vlgmr.msra.gmra.mrb[6].mxu1 %vm291_vm2, %v951_v24 }
 0x914   : > { %v1025_v25 = vpop.f32.mrb[6].mxu0 }
 0x915   : > { %v1036_v26 = vadd.f32 %v1025_v25, %v1706_v19  ;;  %v1442_v27 = vpop.f32.mrb[7].mxu0  ;;  %v1029_v32 = vadd.f32 %v1317_v31, %v1025_v25 }
 0x917   : > { %1038 = vrot.lane.b32.xlu0 %v1036_v26, %s1577_s9  ;;  %v1319_v34 = vmul.f32 -1.442695, %v1029_v32 }
 0x918   : > { %v1126_v28 = vpop.f32.mrb[6].mxu1 }
 0x919   : > { %v1137_v29 = vadd.f32 %v1126_v28, %v1708_v21  ;;  %v1453_v30 = vpop.f32.mrb[7].mxu1  ;;  %v1130_v35 = vadd.f32 %v1320_v33, %v1126_v28  ;;  %1553 = vpow2.f32 %v1319_v34 }
 0x91b   : > { %1139 = vrot.lane.b32.xlu1 %v1137_v29, %s1577_s9  ;;  %v1322_v36 = vmul.f32 -1.442695, %v1130_v35 }
 0x91d   : > { %1555 = vpow2.f32 %v1322_v36 }
 0x923   : > { %v1554_v37 = vpop.eup %1553 }
 0x924   : > { %v1033_v38 = vadd.f32 1.0, %v1554_v37 }
 0x926   : > { %1557 = vrcp.f32 %v1033_v38 }
 0x927   : > { %v1556_v19 = vpop.eup %1555 }
 0x928   : > { %v1134_v39 = vadd.f32 1.0, %v1556_v19 }
 0x92a   : > { %1559 = vrcp.f32 %v1134_v39 }
 0x930   : > { %v1558_v40 = vpop.eup %1557 }
 0x931   : > { %v1048_v50 = vsub.f32 1.0, %v1558_v40  ;;  %v1054_v9 = vmul.f32 %v1558_v40, %v841_v14 }
 0x934   : > { %v1560_v42 = vpop.eup %1559 }
 0x935   : > { %v1149_v52 = vsub.f32 1.0, %v1560_v42  ;;  %v1155_v10 = vmul.f32 %v1560_v42, %v942_v22 }
 0x989   : > { %v1039_v41 = vpop.permute.xlu0 %1038 }
 0x98a   : > { %v1041_v21 = vmul.f32 %v1558_v40, %v1039_v41 }
 0x98c   : > { %1043 = vrot.lane.b32.xlu0 %v1041_v21, %s1577_s9 }
 0x98d   : > { %v1140_v43 = vpop.permute.xlu1 %1139 }
 0x98e   : > { %v1142_v44 = vmul.f32 %v1560_v42, %v1140_v43 }
 0x990   : > { %1144 = vrot.lane.b32.xlu1 %v1142_v44, %s1577_s9 }
 0x9fe   : > { %v1044_v45 = vpop.permute.xlu0 %1043 }
 0x9ff   : > { %v1046_v46 = vadd.f32 %v1317_v31, %v1044_v45 }
 0xa01   : > { %1561 = vtanh.f32 %v1046_v46 }
 0xa02   : > { %v1145_v5 = vpop.permute.xlu1 %1144 }
 0xa03   : > { %v1147_v47 = vadd.f32 %v1320_v33, %v1145_v5 }
 0xa05   : > { %1563 = vtanh.f32 %v1147_v47 }
 0xa0b   : > { %v1562_v48 = vpop.eup %1561 }
 0xa0c   : > { %1050 = vrot.lane.b32.xlu0 %v1562_v48, %s1579_s14 }
 0xa0f   : > { %v1564_v49 = vpop.eup %1563 }
 0xa10   : > { %1151 = vrot.lane.b32.xlu1 %v1564_v49, %s1579_s14 }
 0xa7e   : > { %v1051_v51 = vpop.permute.xlu0 %1050 }
 0xa7f   : > { %v1053_v13 = vmul.f32 %v1051_v51, %v1048_v50 }
 0xa81   : > { %v1055_v4 = vadd.f32 %v1054_v9, %v1053_v13 }
 0xa82   : > { %v1152_v53 = vpop.permute.xlu1 %1151 }
 0xa83   : > { %v1154_v15 = vmul.f32 %v1152_v53, %v1149_v52  ;;  %1158 = vrot.lane.b32.xlu0 %v1055_v4, %s1579_s14 }
 0xa85   : > { %v1156_v54 = vadd.f32 %v1155_v10, %v1154_v15 }
 0xa87   : > { %1164 = vrot.lane.b32.xlu1 %v1156_v54, %s1579_s14 }
 0xaf5   : > { %v1159_v55 = vpop.permute.xlu0 %1158 }
 0xaf6   : > { %1323 = vst.msk [vmem:[%s1631_s7 + $0xc] sm:$0xf] %vm519_vm3, %v1159_v55  ;;  %1168 = vst.msk [vmem:[#allocation2] sm:$0xf] %vm519_vm3, %v1159_v55 }
 0xaf9   : > { %v1165_v56 = vpop.permute.xlu1 %1164 }
 0xafa   : > { %1167 = vst.msk [vmem:[%s1636_s11] sm:$0xf] %vm519_vm3, %v1165_v56  ;;  %1169 = vst.msk [vmem:[#allocation3] sm:$0xf] %vm519_vm3, %v1165_v56 }
 0xafb PF: > { %s16_s18 = sadd.s32 1, %s1571_s18  }
 0xafc   : > { %p13_p6 = scmp.ge.s32.totalorder %s16_s18, 6  }
 0xafe   :  { %15 = sbr.rel (!%p13_p6) target bundleno = 1 (0x1), region = 99 }

// kernel: bigru_forward.3
= control target key start
LH: loop header
LB: loop body
LE: loop exit
PB: predicated region body
PF: predicated region fallthrough
CT: control target
= control target key end

     0   :  { %14 = vsyncpa [#allocation4], 0  ;;  %s1543_s0 = inlined_call_operand.vmem [shape: f32[16,4,96], index: 0, kind: input, shape index: {}]   ;;  %s1544_s1 = inlined_call_operand.vmem [shape: f32[4,96], index: 1, kind: input, shape index: {}]   ;;  %s1545_s2 = inlined_call_operand.vmem [shape: f32[32,96], index: 2, kind: input, shape index: {}]   ;;  %s1546_s3 = inlined_call_operand.vmem [shape: f32[1,32], index: 3, kind: input, shape index: {}]   ;;  %s1547_s4 = inlined_call_operand.vmem [shape: f32[1,32], index: 4, kind: input, shape index: {}]   ;;  %s1548_s5 = inlined_call_operand.vmem [shape: f32[64,4], index: 5, kind: input, shape index: {}]   ;;  %s1549_s6 = inlined_call_operand.vmem [shape: f32[1,4], index: 6, kind: input, shape index: {}]   ;;  %s1550_s7 = inlined_call_operand.hbm [shape: f32[2,4], index: 7, kind: output, shape index: {0}]   ;;  %s1551_s8 = inlined_call_operand.hbm [shape: f32[2,4], index: 8, kind: output, shape index: {1}]  }
   0x1   :  { %15 = vsyncpa [#allocation6], 0  ;;  %s1380_s27 = smov 0  }
   0x2 LB: > { %s1386_s28 = sadd.s32 4294967295, %s1319_s27   ;;  %p1025_p0 = scmp.ge.s32.totalorder %s1319_s27, 1  ;;  %s1319_s27 = sphi %s1380_s27, %s21_s27  }
   0x3   : > { %p258_p1 = scmp.lt.s32.totalorder %s1319_s27, 5 }
   0x5   : > { %p259_p2 = pnand %p1025_p0, %p258_p1 }
   0x6   : > { %s1026_s29 = sshll.u32 (!%p259_p2), %s1386_s28, 2  ;;  %p1028_p4 = scmp.ne.s32.totalorder (!%p259_p2), %s1386_s28, 0 }
   0x7   : > { %262 = sbr.rel (%p259_p2) target bundleno = 3532 (0xdcc), region = 48  ;;  %p288_p3 = scmp.lt.s32.totalorder (!%p259_p2), %s1026_s29, 15 }
   0xe   : > { %s1553_s29 = smov (!%p288_p3, %s1026_s29), 15  ;;  %296 = sbr.rel (%p1028_p4) target bundleno = 21 (0x15), region = 52 }
   0xf   : > { %s1027_s30 = sshll.u32 %s1553_s29, 2  ;;  %vm297_vm0 = vcmask (!%p1028_p4), 257024   ;;  %v1321_v0 = vmov (!%p1028_p4), 0.0  }
  0x10   : > { %s1394_s11 = scalar_lea.vmem %s1543_s0, %s1027_s30  ;;  %298 = vst.msk [vmem:[#allocation2] sm:$0xf] (!%p1028_p4), %vm297_vm0, %v1321_v0 }
  0x15 PF: > { %v299_v1 = vld [vmem:[%s1545_s2] sm:$0xff]  ;;  %v300_v2 = vld [vmem:[%s1545_s2 + $0x8] sm:$0xff]  ;;  %v301_v3 = vld [vmem:[%s1545_s2 + $0x10] sm:$0xff]  ;;  %v1322_v4 = vmov 0.0|0.0   ;;  %vm1323_vm1 = vmmov 0   ;;  %v1324_v7 = vmov 0.0  }
  0x16   : > { %1149 = vmatprep.subr.bf16.mxu0 %v1322_v4  ;;  %v1150_v5 = vpack.c.bf16 %v300_v2, %v299_v1  ;;  %v302_v6 = vld [vmem:[%s1545_s2 + $0x18] sm:$0xff]  ;;  %1091 = vmatprep.mubr.msk.f32.mxu0 %vm1323_vm1, %v1324_v7  ;;  %v1031_v8 = vld [vmem:[%s1546_s3] ss:$0 sm:$0xff]  ;;  %s1325_s22 = smov 64   ;;  %vm306_vm2 = vcmask 261120   ;;  %s1326_s23 = smov 32  }
  0x17   : > { %1155 = vmatprep.subr.bf16.mxu1 %v1322_v4  ;;  %1102 = vmatprep.mubr.msk.f32.mxu1 %vm1323_vm1, %v1324_v7  ;;  %v1153_v9 = vpack.c.bf16 %v302_v6, %v301_v3  ;;  %v304_v10 = vld [vmem:[#allocation2] sm:$0xf]  ;;  %v305_v15 = vld [vmem:[%s1394_s11] sm:$0xf]  ;;  %s1327_s24 = smov 96   ;;  %vm734_vm3 = vcmask 257024  }
  0x18   : > { %1151 = vmatpush3.bf16.msra.mxu0 %v1150_v5  ;;  %392 = vrot.lane.b32.xlu0 %v1031_v8, %s1325_s22  ;;  %v1032_v36 = vld [vmem:[%s1394_s11 + $0x4] sm:$0xf]  ;;  %v1035_v56 = vld [vmem:[%s1394_s11 + $0x8] sm:$0xf]  ;;  %p1041_p5 = scmp.ne.s32.totalorder %s1386_s28, 3 }
  0x19   : > { %1152 = vmatprep.subr.bf16.mxu0 %v1322_v4  ;;  %1157 = vmatpush3.bf16.msra.mxu1 %v1150_v5  ;;  %s1328_s9 = smov (!%p1041_p5), 64   ;;  %vm1330_vm4 = vmmov (!%p1041_p5), 0   ;;  %vm940_vm5 = vcmask (!%p1041_p5), 25600  }
  0x1a   : > { %1158 = vmatprep.subr.bf16.mxu1 %v1322_v4 }
  0x1c   : > { %1154 = vmatpush3.bf16.msra.mxu0 %v1153_v9 }
  0x1d   : > { %1160 = vmatpush3.bf16.msra.mxu1 %v1153_v9  ;;  %1161 = vmatprep.subr.bf16.mxu0 %v1322_v4 }
  0x1e   : > { %1167 = vmatprep.subr.bf16.mxu1 %v1322_v4 }
  0x1f   : > { %1092 = vmatmul.mubr.msk.f32.vlgmr.msra.gmra.mrb[0].mxu0 %vm306_vm2, %v304_v10 }
  0x20   : > { %1163 = vmatpush3.bf16.msra.mxu0 %v1150_v5  ;;  %1113 = vmatprep.mubr.msk.f32.mxu0 %vm1323_vm1, %v1324_v7 }
  0x21   : > { %1164 = vmatprep.subr.bf16.mxu0 %v1322_v4 }
  0x24   : > { %1166 = vmatpush3.bf16.msra.mxu0 %v1153_v9 }
  0x8a   : > { %v1424_v11 = vpop.permute.xlu0 %392 }
  0xf2   : > { %v376_v12 = vpop.f32.mrb[0].mxu0 }
  0xf3   : > { %v395_v13 = vadd.f32 %v1424_v11, %v376_v12  ;;  %v1093_v14 = vpop.f32.mrb[1].mxu0  ;;  %v380_v16 = vadd.f32 %v376_v12, %v305_v15 }
  0xf5   : > { %397 = vrot.lane.b32.xlu0 %v395_v13, %s1325_s22  ;;  %v1030_v17 = vmul.f32 -1.442695, %v380_v16  ;;  %v1038_v13 = vld [vmem:[%s1394_s11 + $0xc] sm:$0xf] }
  0xf7   : > { %1219 = vpow2.f32 %v1030_v17 }
  0xf9   : > { %413 = vrot.lane.b32.xlu0 %v304_v10, %s1326_s23 }
 0x101   : > { %v1220_v18 = vpop.eup %1219 }
 0x102   : > { %v384_v19 = vadd.f32 1.0, %v1220_v18 }
 0x104   : > { %1221 = vrcp.f32 %v384_v19 }
 0x10e   : > { %v1222_v20 = vpop.eup %1221 }
 0x10f   : > { %v407_v27 = vsub.f32 1.0, %v1222_v20 }
 0x167   : > { %v398_v21 = vpop.permute.xlu0 %397 }
 0x168   : > { %v400_v22 = vmul.f32 %v1222_v20, %v398_v21 }
 0x16a   : > { %402 = vrot.lane.b32.xlu1 %v400_v22, %s1325_s22 }
 0x16b   : > { %v414_v26 = vpop.permute.xlu0 %413 }
 0x16c   : > { %v416_v29 = vmul.f32 %v1222_v20, %v414_v26 }
 0x1dc   : > { %v403_v23 = vpop.permute.xlu1 %402 }
 0x1dd   : > { %v405_v24 = vadd.f32 %v403_v23, %v305_v15 }
 0x1df   : > { %1223 = vtanh.f32 %v405_v24 }
 0x1e9   : > { %v1224_v25 = vpop.eup %1223 }
 0x1ea   : > { %409 = vrot.lane.b32.xlu1 %v1224_v25, %s1327_s24 }
 0x25c   : > { %v410_v28 = vpop.permute.xlu1 %409 }
 0x25d   : > { %v412_v30 = vmul.f32 %v410_v28, %v407_v27 }
 0x25f   : > { %v417_v31 = vadd.f32 %v416_v29, %v412_v30  ;;  %v740_v29 = vld [vmem:[%s1544_s1] sm:$0xf] (!%p1041_p5) }
 0x260   : > { %v1042_v30 = vmul.f32 (!%p1041_p5), -1.442695, %v740_v29 }
 0x261   : > { %421 = vrot.lane.b32.xlu1 %v417_v31, %s1327_s24 }
 0x2d3   : > { %v422_v32 = vpop.permute.xlu1 %421 }
 0x2d4   : > { %1103 = vmatmul.mubr.msk.f32.vlgmr.msra.gmra.mrb[0].mxu1 %vm306_vm2, %v422_v32 }
 0x2d5   : > { %1169 = vmatpush3.bf16.msra.mxu1 %v1150_v5  ;;  %1124 = vmatprep.mubr.msk.f32.mxu1 %vm1323_vm1, %v1324_v7 }
 0x2d6   : > { %1170 = vmatprep.subr.bf16.mxu1 %v1322_v4 }
 0x2d9   : > { %1172 = vmatpush3.bf16.msra.mxu1 %v1153_v9 }
 0x3a7   : > { %v491_v33 = vpop.f32.mrb[0].mxu1 }
 0x3a8   : > { %v502_v34 = vadd.f32 %v491_v33, %v1424_v11  ;;  %v1104_v35 = vpop.f32.mrb[1].mxu1  ;;  %v495_v37 = vadd.f32 %v1032_v36, %v491_v33  ;;  %v1043_v33 = vld [vmem:[%s1547_s4] ss:$0 sm:$0xff] (!%p1041_p5) }
 0x3aa   : > { %504 = vrot.lane.b32.xlu0 %v502_v34, %s1325_s22  ;;  %v1034_v38 = vmul.f32 -1.442695, %v495_v37 }
 0x3ac   : > { %1225 = vpow2.f32 %v1034_v38  ;;  %v778_v38 = vld [vmem:[%s1548_s5 + $0x20] sm:$0xff] (!%p1041_p5) }
 0x3b6   : > { %v1226_v39 = vpop.eup %1225 }
 0x3b7   : > { %v499_v40 = vadd.f32 1.0, %v1226_v39  ;;  %v779_v39 = vld [vmem:[%s1548_s5 + $0x28] sm:$0xff] (!%p1041_p5) }
 0x3b9   : > { %1227 = vrcp.f32 %v499_v40  ;;  %v780_v40 = vld [vmem:[%s1548_s5 + $0x30] sm:$0xff] (!%p1041_p5) }
 0x3c3   : > { %v1228_v41 = vpop.eup %1227 }
 0x3c4   : > { %v514_v47 = vsub.f32 1.0, %v1228_v41  ;;  %v520_v49 = vmul.f32 %v1228_v41, %v417_v31 }
 0x41c   : > { %v505_v42 = vpop.permute.xlu0 %504 }
 0x41d   : > { %v507_v43 = vmul.f32 %v1228_v41, %v505_v42  ;;  %v1329_v41 = vmov (!%p1041_p5), 0.0|0.0   ;;  %v1174_v42 = vpack.c.bf16 (!%p1041_p5), %v779_v39, %v778_v38 }
 0x41e   : > { %1173 = vmatprep.subr.bf16.mxu0 (!%p1041_p5), %v1329_v41  ;;  %1179 = vmatprep.subr.bf16.mxu1 (!%p1041_p5), %v1329_v41 }
 0x41f   : > { %509 = vrot.lane.b32.xlu1 %v507_v43, %s1325_s22  ;;  %v781_v43 = vld [vmem:[%s1548_s5 + $0x38] sm:$0xff] (!%p1041_p5) }
 0x491   : > { %v510_v44 = vpop.permute.xlu1 %509 }
 0x492   : > { %v512_v45 = vadd.f32 %v1032_v36, %v510_v44  ;;  %v774_v44 = vld [vmem:[%s1548_s5] sm:$0xff] (!%p1041_p5) }
 0x494   : > { %1229 = vtanh.f32 %v512_v45  ;;  %v775_v45 = vld [vmem:[%s1548_s5 + $0x8] sm:$0xff] (!%p1041_p5) }
 0x49e   : > { %v1230_v46 = vpop.eup %1229 }
 0x49f   : > { %516 = vrot.lane.b32.xlu0 %v1230_v46, %s1327_s24 }
 0x511   : > { %v517_v48 = vpop.permute.xlu0 %516 }
 0x512   : > { %v519_v50 = vmul.f32 %v517_v48, %v514_v47  ;;  %v1180_v47 = vpack.c.bf16 (!%p1041_p5), %v775_v45, %v774_v44  ;;  %v1331_v48 = vmov (!%p1041_p5), 0.0  }
 0x514   : > { %v521_v51 = vadd.f32 %v520_v49, %v519_v50  ;;  %v1177_v49 = vpack.c.bf16 (!%p1041_p5), %v781_v43, %v780_v40  ;;  %v776_v50 = vld [vmem:[%s1548_s5 + $0x10] sm:$0xff] (!%p1041_p5) }
 0x516   : > { %525 = vrot.lane.b32.xlu1 %v521_v51, %s1327_s24 }
 0x588   : > { %v526_v52 = vpop.permute.xlu1 %525 }
 0x589   : > { %1114 = vmatmul.mubr.msk.f32.vlgmr.msra.gmra.mrb[2].mxu0 %vm306_vm2, %v526_v52 }
 0x58a   : > { %1135 = vmatprep.mubr.msk.f32.mxu0 (!%p1041_p5), %vm1330_vm4, %v1331_v48  ;;  %1175 = vmatpush3.bf16.msra.mxu0 (!%p1041_p5), %v1174_v42 }
 0x58b   : > { %1176 = vmatprep.subr.bf16.mxu0 (!%p1041_p5), %v1329_v41 }
 0x58e   : > { %1178 = vmatpush3.bf16.msra.mxu0 (!%p1041_p5), %v1177_v49 }
 0x65c   : > { %v595_v53 = vpop.f32.mrb[2].mxu0 }
 0x65d   : > { %v606_v54 = vadd.f32 %v595_v53, %v1424_v11  ;;  %v1115_v55 = vpop.f32.mrb[3].mxu0  ;;  %v599_v57 = vadd.f32 %v1035_v56, %v595_v53 }
 0x65f   : > { %608 = vrot.lane.b32.xlu0 %v606_v54, %s1325_s22  ;;  %v1037_v58 = vmul.f32 -1.442695, %v599_v57 }
 0x661   : > { %1231 = vpow2.f32 %v1037_v58 }
 0x66b   : > { %v1232_v59 = vpop.eup %1231 }
 0x66c   : > { %v603_v60 = vadd.f32 1.0, %v1232_v59 }
 0x66e   : > { %1233 = vrcp.f32 %v603_v60 }
 0x678   : > { %v1234_v61 = vpop.eup %1233 }
 0x679   : > { %v618_v3 = vsub.f32 1.0, %v1234_v61  ;;  %v624_v5 = vmul.f32 %v1234_v61, %v521_v51  ;;  %v777_v51 = vld [vmem:[%s1548_s5 + $0x18] sm:$0xff] (!%p1041_p5) }
 0x67a   : > { %v1183_v52 = vpack.c.bf16 (!%p1041_p5), %v777_v51, %v776_v50 }
 0x6d1   : > { %v609_v62 = vpop.permute.xlu0 %608 }
 0x6d2   : > { %v611_v63 = vmul.f32 %v1234_v61, %v609_v62 }
 0x6d4   : > { %613 = vrot.lane.b32.xlu1 %v611_v63, %s1325_s22 }
 0x746   : > { %v614_v0 = vpop.permute.xlu1 %613 }
 0x747   : > { %v616_v1 = vadd.f32 %v1035_v56, %v614_v0 }
 0x749   : > { %1235 = vtanh.f32 %v616_v1  ;;  %v1046_v1 = vld [vmem:[%s1549_s6] ss:$0 sm:$0xff] (!%p1041_p5) }
 0x753   : > { %v1236_v2 = vpop.eup %1235 }
 0x754   : > { %620 = vrot.lane.b32.xlu0 %v1236_v2, %s1327_s24 }
 0x7c6   : > { %v621_v4 = vpop.permute.xlu0 %620 }
 0x7c7   : > { %v623_v6 = vmul.f32 %v621_v4, %v618_v3 }
 0x7c9   : > { %v625_v7 = vadd.f32 %v624_v5, %v623_v6 }
 0x7cb   : > { %629 = vrot.lane.b32.xlu1 %v625_v7, %s1327_s24 }
 0x83d   : > { %v630_v8 = vpop.permute.xlu1 %629 }
 0x83e   : > { %1125 = vmatmul.mubr.msk.f32.vlgmr.msra.gmra.mrb[2].mxu1 %vm306_vm2, %v630_v8 }
 0x83f   : > { %1146 = vmatprep.mubr.msk.f32.mxu1 (!%p1041_p5), %vm1330_vm4, %v1331_v48  ;;  %1181 = vmatpush3.bf16.msra.mxu1 (!%p1041_p5), %v1180_v47 }
 0x840   : > { %1182 = vmatprep.subr.bf16.mxu1 (!%p1041_p5), %v1329_v41 }
 0x843   : > { %1184 = vmatpush3.bf16.msra.mxu1 (!%p1041_p5), %v1183_v52 }
 0x911   : > { %v699_v9 = vpop.f32.mrb[2].mxu1 }
 0x912   : > { %v710_v10 = vadd.f32 %v699_v9, %v1424_v11  ;;  %v1126_v12 = vpop.f32.mrb[3].mxu1  ;;  %v703_v14 = vadd.f32 %v1038_v13, %v699_v9 }
 0x914   : > { %712 = vrot.lane.b32.xlu0 %v710_v10, %s1325_s22  ;;  %v1040_v15 = vmul.f32 -1.442695, %v703_v14 }
 0x916   : > { %1237 = vpow2.f32 %v1040_v15 }
 0x920   : > { %v1238_v16 = vpop.eup %1237 }
 0x921   : > { %v707_v17 = vadd.f32 1.0, %v1238_v16 }
 0x923   : > { %1239 = vrcp.f32 %v707_v17 }
 0x92d   : > { %v1240_v18 = vpop.eup %1239 }
 0x92e   : > { %v722_v11 = vsub.f32 1.0, %v1240_v18  ;;  %v728_v25 = vmul.f32 %v1240_v18, %v625_v7 }
 0x986   : > { %v713_v19 = vpop.permute.xlu0 %712 }
 0x987   : > { %v715_v20 = vmul.f32 %v1240_v18, %v713_v19 }
 0x989   : > { %717 = vrot.lane.b32.xlu1 %v715_v20, %s1325_s22  ;;  %s1332_s22 = smov (!%p1041_p5), 96  }
 0x9fb   : > { %v718_v21 = vpop.permute.xlu1 %717 }
 0x9fc   : > { %v720_v22 = vadd.f32 %v1038_v13, %v718_v21 }
 0x9fe   : > { %1241 = vtanh.f32 %v720_v22 }
 0x9ff   : > { %1243 = vpow2.f32 (!%p1041_p5), %v1042_v30 }
 0xa08   : > { %v1242_v23 = vpop.eup %1241 }
 0xa09   : > { %724 = vrot.lane.b32.xlu0 %v1242_v23, %s1327_s24  ;;  %v1244_v31 = vpop.eup (!%p1041_p5), %1243 }
 0xa0a   : > { %v745_v32 = vadd.f32 (!%p1041_p5), 1.0, %v1244_v31 }
 0xa0c   : > { %1245 = vrcp.f32 (!%p1041_p5), %v745_v32 }
 0xa16   : > { %v1246_v34 = vpop.eup (!%p1041_p5), %1245 }
 0xa17   : > { %v754_v35 = vmul.f32 (!%p1041_p5), %v1246_v34, %v1043_v33  ;;  %v761_v53 = vsub.f32 (!%p1041_p5), 1.0, %v1246_v34 }
 0xa19   : > { %756 = vrot.lane.b32.xlu0 (!%p1041_p5), %v754_v35, %s1328_s9 }
 0xa7b   : > { %v725_v24 = vpop.permute.xlu0 %724 }
 0xa7c   : > { %v727_v26 = vmul.f32 %v725_v24, %v722_v11 }
 0xa7e   : > { %v729_v27 = vadd.f32 %v728_v25, %v727_v26 }
 0xa80   : > { %731 = vrot.lane.b32.xlu1 %v729_v27, %s1327_s24  ;;  %v767_v57 = vrot.slane (!%p1041_p5), %v729_v27, 2 }
 0xa82   : > { %v769_v59 = vmul.f32 (!%p1041_p5), %v767_v57, %v729_v27 }
 0xa8b   : > { %v757_v36 = vpop.permute.xlu0 (!%p1041_p5), %756 }
 0xa8c   : > { %v759_v37 = vadd.f32 (!%p1041_p5), %v757_v36, %v740_v29 }
 0xa8e   : > { %1247 = vtanh.f32 (!%p1041_p5), %v759_v37 }
 0xa98   : > { %v1248_v46 = vpop.eup (!%p1041_p5), %1247 }
 0xa99   : > { %763 = vrot.lane.b32.xlu0 (!%p1041_p5), %v1248_v46, %s1332_s22 }
 0xaed   : > { %739 = sbr.rel (%p1041_p5) target bundleno = 3484 (0xd9c), region = 56 }
 0xaf2   : > { %v732_v28 = vpop.permute.xlu1 %731 }
 0xaf3   : > { %735 = vst.msk [vmem:[#allocation2] sm:$0xf] %vm734_vm3, %v732_v28 }
 0xb0b   : > { %v764_v54 = vpop.permute.xlu0 %763 }
 0xb0c   : > { %v766_v55 = vmul.f32 %v764_v54, %v761_v53 }
 0xb0e   : > { %v771_v56 = vrot.slane %v766_v55, 2 }
 0xb10   : > { %v773_v58 = vmul.f32 %v771_v56, %v766_v55 }
 0xb12   : > { %783 = vrot.lane.b32.xlu1 %v773_v58, %s1332_s22 }
 0xb16   : > { %858 = vrot.lane.b32.xlu1 %v769_v59, %s1332_s22 }
 0xb84   : > { %v784_v60 = vpop.permute.xlu1 %783 }
 0xb85   : > { %1136 = vmatmul.mubr.msk.f32.vlgmr.msra.gmra.mrb[0].mxu0 %vm306_vm2, %v784_v60 }
 0xb88   : > { %v859_v61 = vpop.permute.xlu1 %858 }
 0xb89   : > { %1147 = vmatmul.mubr.msk.f32.vlgmr.msra.gmra.mrb[0].mxu1 %vm306_vm2, %v859_v61 }
 0xc58   : > { %v853_v62 = vpop.f32.mrb[0].mxu0 }
 0xc59   : > { %v1137_v63 = vpop.f32.mrb[1].mxu0 }
 0xc5c   : > { %v928_v0 = vpop.f32.mrb[0].mxu1 }
 0xc5d   : > { %v929_v2 = vadd.f32 %v928_v0, %v853_v62  ;;  %v1148_v3 = vpop.f32.mrb[1].mxu1 }
 0xc5f   : > { %v939_v4 = vadd.f32 %v1046_v1, %v929_v2 }
 0xc61   : > { %v942_v5 = vsel %vm940_vm5, %v939_v4, -inf  ;;  %941 = vst.msk [vmem:[#allocation3] sm:$0x3] %vm940_vm5, %v939_v4 }
 0xc62   : > { %943 = vmax.xlane.f32.xlu0 %v942_v5 }
 0xcef   : > { %v944_v6 = vpop.xlane.xlu0 %943 }
 0xcf0   : > { %v945_v7 = vsub.f32 %v939_v4, %v944_v6 }
 0xcf2   : > { %v946_v8 = vmul.f32 1.442695, %v945_v7 }
 0xcf4   : > { %1249 = vpow2.f32 %v946_v8 }
 0xcfe   : > { %v1250_v9 = vpop.eup %1249 }
 0xcff   : > { %v948_v10 = vsel %vm940_vm5, %v1250_v9, 0.0 }
 0xd00   : > { %949 = vadd.xlane.f32.xlu1 %v948_v10 }
 0xd8d   : > { %v950_v12 = vpop.xlane.xlu1 %949 }
 0xd8e   : > { %1251 = vrcp.f32 %v950_v12 }
 0xd98   : > { %v1252_v13 = vpop.eup %1251 }
 0xd99   : > { %v952_v14 = vmul.f32 %v1252_v13, %v1250_v9 }
 0xd9b   : > { %953 = vst.msk [vmem:[#allocation5] sm:$0x3] %vm940_vm5, %v952_v14 }
 0xd9c PF: > { %p1193_p6 = scmp.eq.s32.totalorder %s1386_s28, 3  ;;  %s1333_s9 = smov [#allocation3]  }
 0xd9d   : > { %s961_s10 = sshll.u32 %s1333_s9, 4  ;;  %s1334_s11 = smov [#allocation5]   ;;  %s962_s10 = int_to_ptr.vmem [resolvable:$true] %s961_s10 }
 0xd9e   : > { %s972_s12 = sshll.u32 %s1334_s11, 4  ;;  %s1253_s13 = scalar_lea.vmem %s962_s10, 32  ;;  %s973_s12 = int_to_ptr.vmem [resolvable:$true] %s972_s12 }
 0xd9f   : > { %p1254_p7 = scmp.ne.s32.totalorder %s962_s10, %s1253_s13  ;;  %p1260_p10 = scmp.lt.s32.totalorder %s962_s10, %s962_s10 }
 0xda0   : > { %p1261_p11 = scmp.lt.s32.totalorder %s1253_s13, %s1253_s13 }
 0xda1   : > { %p1255_p8 = pnand %p1254_p7, %p1193_p6 }
 0xda2   : > { %p1262_p12 = por %p1261_p11, %p1260_p10 }
 0xda3   : > { %p1256_p9 = pneg %p1255_p8 }
 0xda5   : > { %p1263_p13 = pnand %p1262_p12, %p1256_p9 }
 0xda7   : > { %1266 = shalt.err (!%p1263_p13)
}
 0xda8   : > { %s1267_s16 = scalar_lea.hbm %s1550_s7, 32 }
 0xda9   : > { %p1268_p0 = scmp.ne.s32.totalorder %s1550_s7, %s1267_s16  ;;  %p1273_p3 = scmp.lt.u32.totalorder %s1267_s16, %s1550_s7 }
 0xdab   : > { %p1269_p1 = pnand %p1268_p0, %p1193_p6 }
 0xdad   : > { %p1270_p2 = pneg %p1269_p1 }
 0xdaf   : > { %p1275_p4 = pnand %p1273_p3, %p1270_p2 }
 0xdb1   : > { %1278 = shalt.err (!%p1275_p4)
}
 0xdb2   : > { %1186 = dma.vmem_to_hbm [thread:$0]  (%p1193_p6), %s962_s10, 32, %s1550_s7, [#allocation4]  }
 0xdb3   : > { %s1279_s23 = scalar_lea.vmem %s973_s12, 32  ;;  %p1286_p9 = scmp.lt.s32.totalorder %s973_s12, %s973_s12 }
 0xdb4   : > { %p1280_p5 = scmp.ne.s32.totalorder %s973_s12, %s1279_s23  ;;  %p1287_p10 = scmp.lt.s32.totalorder %s1279_s23, %s1279_s23 }
 0xdb6   : > { %p1281_p7 = pnand %p1280_p5, %p1193_p6  ;;  %p1288_p11 = por %p1287_p10, %p1286_p9 }
 0xdb8   : > { %p1282_p8 = pneg %p1281_p7 }
 0xdba   : > { %p1289_p12 = pnand %p1288_p11, %p1282_p8 }
 0xdbc   : > { %1292 = shalt.err (!%p1289_p12)
}
 0xdbd   : > { %s1293_s26 = scalar_lea.hbm %s1551_s8, 32 }
 0xdbe   : > { %p1294_p13 = scmp.ne.s32.totalorder %s1551_s8, %s1293_s26  ;;  %p1299_p2 = scmp.lt.u32.totalorder %s1293_s26, %s1551_s8 }
 0xdc0   : > { %p1295_p0 = pnand %p1294_p13, %p1193_p6 }
 0xdc2   : > { %p1296_p1 = pneg %p1295_p0 }
 0xdc4   : > { %p1301_p3 = pnand %p1299_p2, %p1296_p1 }
 0xdc6   : > { %1304 = shalt.err (!%p1301_p3)
}
 0xdc7   : > { %1188 = dma.vmem_to_hbm [thread:$0]  (%p1193_p6), %s973_s12, 32, %s1551_s8, [#allocation6]  }
 0xdc8   : > { %1310 = dma.done.wait (%p1193_p6), [#allocation4], 32  }
 0xdc9   : > { %1312 = vsyncadd (%p1193_p6), [#allocation4], 4294967264 }
 0xdca   : > { %1314 = dma.done.wait (%p1193_p6), [#allocation6], 32  }
 0xdcb   : > { %1316 = vsyncadd (%p1193_p6), [#allocation6], 4294967264 }
 0xdcc PF: > { %s21_s27 = sadd.s32 1, %s1319_s27  }
 0xdcd   : > { %p18_p4 = scmp.ge.s32.totalorder %s21_s27, 6  }
 0xdcf   :  { %20 = sbr.rel (!%p18_p4) target bundleno = 2 (0x2), region = 94 }
 0xdd6   :  { %989 = vsyncpa [#allocation4], 1 }
 0xdd7   :  { %991 = vsyncpa [#allocation4 + $0x1], 1 }
 0xdd8   :  { %992 = vsyncpa [#allocation6], 1 }

</bundles_post_ra>
